<compile_context>
chip_gen: v7x
topology: tpu7x:2x2x1
jax: 0.10.0
libtpu: 0.0.40
codegen_flags: <defaults>
</compile_context>

<pallas_src>
import jax
import jax.numpy as jnp
from jax.experimental import pallas as pl
from jax.experimental.pallas import tpu as pltpu

EPS = 1e-5


# ---------------------------------------------------------------------------
# Pallas kernel: de-projection matmul (BN already folded into w_ref / b_ref)
#   o = x @ W' + b'   x: (tm, Cin) bf16 (streamed), W': (Cin, Nout) bf16
#                     (VMEM-resident), b': (1, Nout) f32, o: (tm, Nout) f32
# ---------------------------------------------------------------------------
def deproj_kernel(x_ref, w_ref, b_ref, o_ref):
    o_ref[...] = (
        jnp.dot(x_ref[...], w_ref[...], preferred_element_type=jnp.float32)
        + b_ref[...]
    ).astype(o_ref.dtype)


# ---------------------------------------------------------------------------
# Wrapper
# ---------------------------------------------------------------------------
def patch_merge(x, gamma, beta, weight, bias, *, patch_size, tm=512,
                matmul_dtype=jnp.bfloat16, out_dtype=jnp.float32):
    """PatchMerge forward.

    x:      (N, Cin, H, W)      input feature map (NCHW)
    gamma:  (Cin,)              BatchNorm2d weight (training-mode BN)
    beta:   (Cin,)              BatchNorm2d bias
    weight: (Cin, Cout, P, P)   ConvTranspose2d weight (stride=kernel=P, pad 0)
    bias:   (Cout,)             ConvTranspose2d bias
    returns (N, Cout, H*P, W*P)
    """
    N, Cin, H, W = x.shape
    P = patch_size
    Cout = weight.shape[1]
    M = N * H * W
    Nout = Cout * P * P
    assert tm % 128 == 0
    # Module semantics: norm = BatchNorm2d(out_chans) is applied to the deproj
    # *input* (embed_dim channels); as in PyTorch this only type-checks when
    # embed_dim == out_chans, which the (Cin,)-shaped gamma/beta enforce here.
    assert gamma.shape == (Cin,) and beta.shape == (Cin,)
    # Folded weight is kept fully VMEM-resident (fits easily for typical
    # embed_dim/out_chans/patch_size; 768x768 bf16 is ~1.2 MB).
    assert Cin * Nout * 2 <= 16 * 1024 * 1024, (
        "TODO(synk): tile Nout/K for weights too large to keep VMEM-resident")

    # ---- BatchNorm2d batch statistics (training mode, biased variance) -----
    # Plain-JAX reduction over the native NCHW layout: XLA fuses it with the
    # NCHW->token transpose below (per perf review), and jnp.var is two-pass
    # (no sumsq/M - mean^2 cancellation).
    xf = x.astype(jnp.float32)
    mean = jnp.mean(xf, axis=(0, 2, 3))
    var = jnp.var(xf, axis=(0, 2, 3))
    scale = gamma.astype(jnp.float32) * jax.lax.rsqrt(var + EPS)   # (Cin,)
    shift = beta.astype(jnp.float32) - mean * scale                # (Cin,)
    # TODO(synk): running_mean/running_var buffer updates (stateful; no effect
    # on the forward output) are not materialized.

    # ---- fold BN into the conv-transpose weight/bias (one-off O(Cin*Nout)) --
    w2d = weight.reshape(Cin, Nout).astype(jnp.float32)
    w_eff = (scale[:, None] * w2d).astype(matmul_dtype)            # (Cin, Nout)
    b_eff = (shift @ w2d
             + jnp.tile(bias.reshape(Cout, 1, 1), (1, P, P)).reshape(Nout)
             ).reshape(1, Nout).astype(jnp.float32)

    # ---- tokens: NCHW -> (M, Cin), cast to bf16 in the same XLA pass --------
    # TODO(synk): at production sizes this input transpose could be removed by
    # a (Nout, spatial)-layout kernel computing W'^T @ x on the channel-major
    # input; kept here for the simpler, lane-dense token layout.
    tokens = jnp.transpose(x, (0, 2, 3, 1)).reshape(M, Cin).astype(matmul_dtype)

    # ---- tile size / remainder handling -------------------------------------
    tm = min(tm, pl.cdiv(M, 128) * 128)       # multiple of 128, <= padded M
    M_pad = pl.cdiv(M, tm) * tm
    if M_pad != M:
        tokens = jnp.pad(tokens, ((0, M_pad - M), (0, 0)))

    out_tok = pl.pallas_call(
        deproj_kernel,
        out_shape=jax.ShapeDtypeStruct((M_pad, Nout), out_dtype),
        grid_spec=pltpu.PrefetchScalarGridSpec(
            num_scalar_prefetch=0,
            grid=(M_pad // tm,),
            in_specs=[
                pl.BlockSpec((tm, Cin), lambda i: (i, 0)),     # tokens (streamed)
                pl.BlockSpec((Cin, Nout), lambda i: (0, 0)),   # folded weight (resident)
                pl.BlockSpec((1, Nout), lambda i: (0, 0)),     # folded bias (resident)
            ],
            out_specs=pl.BlockSpec((tm, Nout), lambda i: (i, 0))),
        compiler_params=pltpu.CompilerParams(
            dimension_semantics=("parallel",),
            vmem_limit_bytes=32 * 1024 * 1024),
    )(tokens, w_eff, b_eff)

    if M_pad != M:
        out_tok = out_tok[:M]

    # scatter tokens back to NCHW: out[n, co, h*P+pi, w*P+pj]
    out = out_tok.reshape(N, H, W, Cout, P, P)
    out = jnp.transpose(out, (0, 3, 1, 4, 2, 5)).reshape(N, Cout, H * P, W * P)
    return out


# ---------------------------------------------------------------------------
# Pure-JAX reference (f32 throughout) for verification
# ---------------------------------------------------------------------------
def reference(x, gamma, beta, weight, bias, patch_size):
    P = patch_size
    mean = jnp.mean(x, axis=(0, 2, 3), keepdims=True)
    var = jnp.var(x, axis=(0, 2, 3), keepdims=True)     # biased (BN train mode)
    xn = (x - mean) / jnp.sqrt(var + EPS)
    xn = xn * gamma.reshape(1, -1, 1, 1) + beta.reshape(1, -1, 1, 1)
    out = jnp.einsum('nihw,iopq->nohpwq', xn, weight)
    N, _, H, W = x.shape
    Cout = weight.shape[1]
    out = out.reshape(N, Cout, H * P, W * P) + bias.reshape(1, -1, 1, 1)
    return out


if __name__ == "__main__":
    # embed_dim == out_chans so that BatchNorm2d(out_chans) applied to the
    # deproj input is well-defined (as required by the PyTorch module).
    batch, embed_dim, out_chans = 2, 32, 32
    H = W = 16
    patch_size = 4          # kernel_size == stride == 4, padding 0, groups 1

    key = jax.random.PRNGKey(0)
    kx, kx2, kw, kb, kg, kbeta = jax.random.split(key, 6)

    bound = 1.0 / (embed_dim * patch_size * patch_size) ** 0.5
    weight = jax.random.uniform(
        kw, (embed_dim, out_chans, patch_size, patch_size),
        minval=-bound, maxval=bound, dtype=jnp.float32)
    bias = jax.random.uniform(kb, (out_chans,), minval=-bound, maxval=bound,
                              dtype=jnp.float32)
    # non-trivial BN affine params so the weight/bias folding is exercised
    gamma = 1.0 + 0.5 * jax.random.uniform(kg, (embed_dim,),
                                           minval=-1.0, maxval=1.0)
    beta = 0.2 * jax.random.normal(kbeta, (embed_dim,))

    def check(x_in, tm):
        out = jax.block_until_ready(
            patch_merge(x_in, gamma, beta, weight, bias,
                        patch_size=patch_size, tm=tm))
        ref = reference(x_in, gamma, beta, weight, bias, patch_size)
        assert out.shape == ref.shape, (out.shape, ref.shape)
        err = jnp.max(jnp.abs(out - ref))
        # bf16 matmul inputs with f32 accumulation -> relaxed tolerance
        assert jnp.allclose(out, ref, atol=2e-2, rtol=2e-2), f"max err {err}"

    x = jax.random.normal(kx, (batch, embed_dim, H, W), dtype=jnp.float32)
    check(x, tm=512)           # single grid step, resident weight
    check(x, tm=128)           # multi-step grid, resident weight reused
    x_odd = jax.random.normal(kx2, (batch, embed_dim, 15, 15),
                              dtype=jnp.float32)
    check(x_odd, tm=128)       # M=450 -> padded to 512 (remainder handling)

    print("KERNEL_OK")
</pallas_src>

<mosaic_0001>
module attributes {stable_mosaic.version = 11 : i64} {
  func.func @deproj_kernel(%arg0: i32, %arg1: memref<512x32xbf16, #tpu.memory_space<vmem>>, %arg2: memref<32x512xbf16, #tpu.memory_space<vmem>>, %arg3: memref<1x512xf32, #tpu.memory_space<vmem>>, %arg4: memref<512x512xf32, #tpu.memory_space<vmem>>) attributes {dimension_semantics = [#tpu.dimension_semantics<parallel>], iteration_bounds = array<i64: 1>, scalar_prefetch = 0 : i64, scratch_operands = 0 : i64, tpu.core_type = #tpu.core_type<tc>, window_params = [{transform_indices = @transform_0, window_bounds = array<i64: 512, 32>}, {pipeline_mode = #tpu.pipeline_mode<synchronous>, transform_indices = @transform_1, window_bounds = array<i64: 32, 512>}, {pipeline_mode = #tpu.pipeline_mode<synchronous>, transform_indices = @transform_2, window_bounds = array<i64: 1, 512>}, {transform_indices = @transform_3, window_bounds = array<i64: 512, 512>}]} {
    %c0 = arith.constant 0 : index
    %c0_0 = arith.constant 0 : index
    %0 = vector.load %arg1[%c0, %c0_0] : memref<512x32xbf16, #tpu.memory_space<vmem>>, vector<512x32xbf16>
    %c0_1 = arith.constant 0 : index
    %c0_2 = arith.constant 0 : index
    %1 = vector.load %arg2[%c0_1, %c0_2] : memref<32x512xbf16, #tpu.memory_space<vmem>>, vector<32x512xbf16>
    %cst = arith.constant dense<0.000000e+00> : vector<512x512xf32>
    %2 = tpu.matmul %0, %1, %cst {dimension_numbers = #tpu.dot_dimension_numbers<[1], [0], [0], [1], [0, 0, 1, 1], [], []>} : vector<512x32xbf16>, vector<32x512xbf16>, vector<512x512xf32> -> vector<512x512xf32>
    %c0_3 = arith.constant 0 : index
    %c0_4 = arith.constant 0 : index
    %3 = vector.load %arg3[%c0_3, %c0_4] : memref<1x512xf32, #tpu.memory_space<vmem>>, vector<1x512xf32>
    %4 = vector.broadcast %3 : vector<1x512xf32> to vector<512x512xf32>
    %5 = arith.addf %2, %4 : vector<512x512xf32>
    %c0_5 = arith.constant 0 : index
    %c0_6 = arith.constant 0 : index
    %6 = vector.load %arg4[%c0_5, %c0_6] : memref<512x512xf32, #tpu.memory_space<vmem>>, vector<512x512xf32>
    tpu.vector_store %arg4[%c0_5, %c0_6], %5 {strides = array<i32>} : memref<512x512xf32, #tpu.memory_space<vmem>>, vector<512x512xf32>,
    return
  }
  func.func @transform_0(%arg0: i32) -> (i32, i32) {
    %c0_i32 = arith.constant 0 : i32
    %c0_i32_0 = arith.constant 0 : i32
    return %arg0, %c0_i32 : i32, i32
  }
  func.func @transform_1(%arg0: i32) -> (i32, i32) {
    %c0_i32 = arith.constant 0 : i32
    %c0_i32_0 = arith.constant 0 : i32
    %c0_i32_1 = arith.constant 0 : i32
    return %c0_i32, %c0_i32_0 : i32, i32
  }
  func.func @transform_2(%arg0: i32) -> (i32, i32) {
    %c0_i32 = arith.constant 0 : i32
    %c0_i32_0 = arith.constant 0 : i32
    %c0_i32_1 = arith.constant 0 : i32
    return %c0_i32, %c0_i32_0 : i32, i32
  }
  func.func @transform_3(%arg0: i32) -> (i32, i32) {
    %c0_i32 = arith.constant 0 : i32
    %c0_i32_0 = arith.constant 0 : i32
    return %arg0, %c0_i32 : i32, i32
  }
}

</mosaic_0001>

<bundles_post_ra>
// kernel: tpu_custom_call.1
= control target key start
LH: loop header
LB: loop body
LE: loop exit
PB: predicated region body
PF: predicated region fallthrough
CT: control target
= control target key end

     0   :  { %v1561_v2 = vmov 0   ;;  %vm310_vm0 = vcmask 261120   ;;  %s2112_s0 = inlined_call_operand.vmem [shape: bf16[512,32], index: 0, kind: input, shape index: {}]   ;;  %s2113_s1 = inlined_call_operand.vmem [shape: bf16[32,512], index: 1, kind: input, shape index: {}]   ;;  %s2114_s2 = inlined_call_operand.vmem [shape: f32[1,512], index: 2, kind: input, shape index: {}]   ;;  %s2115_s3 = inlined_call_operand.hbm [shape: f32[512,512], index: 3, kind: output, shape index: {}]  }
   0x1   :  { %v1493_v0 = vld [vmem:[%s2113_s1 + $0x4] ss:$16 sps:$4 sm:$0xff]   ;;  %v1495_v1 = vld [vmem:[%s2113_s1 + $0xc] ss:$16 sps:$4 sm:$0xff]   ;;  %439 = vmatprep.mubr.bf16.mxu0 %v1561_v2  ;;  %792 = vmatprep.mubr.bf16.mxu1 %v1561_v2  ;;  %v1497_v3 = vld [vmem:[%s2113_s1] ss:$16 sps:$4 sm:$0xff]  }
   0x2   :  { %407 = vmatprep.subr.bf16.mxu0 %v1493_v0  ;;  %v1498_v4 = vld [vmem:[%s2113_s1 + $0x8] ss:$16 sps:$4 sm:$0xff]   ;;  %760 = vmatprep.subr.bf16.mxu1 %v1495_v1  ;;  %v1499_v5 = vld [vmem:[%s2113_s1 + $0x24] ss:$16 sps:$4 sm:$0xff]   ;;  %v1501_v6 = vld [vmem:[%s2113_s1 + $0x2c] ss:$16 sps:$4 sm:$0xff]  }
   0x3   :  { %408 = vmatpush1.bf16.msra.mxu0 %v1497_v3  ;;  %761 = vmatpush1.bf16.msra.mxu1 %v1498_v4  ;;  %v1503_v7 = vld [vmem:[%s2113_s1 + $0x20] ss:$16 sps:$4 sm:$0xff]   ;;  %v1504_v8 = vld [vmem:[%s2113_s1 + $0x28] ss:$16 sps:$4 sm:$0xff]  }
   0x4   :  { %409 = vmatprep.subr.bf16.mxu0 %v1499_v5  ;;  %762 = vmatprep.subr.bf16.mxu1 %v1501_v6  ;;  %v1505_v9 = vld [vmem:[%s2112_s0] sm:$0xff]   ;;  %v1506_v10 = vld [vmem:[%s2112_s0 + $0x8] sm:$0xff]   ;;  %v1507_v11 = vld [vmem:[%s2112_s0 + $0x10] sm:$0xff]  }
   0x5   :  { %v1508_v12 = vld [vmem:[%s2112_s0 + $0x18] sm:$0xff]  }
   0x7   :  { %410 = vmatpush1.bf16.msra.mxu0 %v1503_v7  ;;  %763 = vmatpush1.bf16.msra.mxu1 %v1504_v8 }
   0xa   :  { %1425 = vmatmul.mubr.msk.bf16.vlgmr.msra.gmra.mrb[0].mxu0 %vm310_vm0, %v1505_v9  ;;  %1457 = vmatmul.mubr.msk.bf16.vlgmr.msra.gmra.mrb[0].mxu1 %vm310_vm0, %v1505_v9 }
   0xb   :  { %449 = vmatprep.mubr.bf16.mxu0 %v1561_v2  ;;  %802 = vmatprep.mubr.bf16.mxu1 %v1561_v2 }
  0x12   :  { %1426 = vmatmul.mubr.msk.bf16.gmra.mrb[4].mxu0 %vm310_vm0, %v1506_v10  ;;  %1458 = vmatmul.mubr.msk.bf16.gmra.mrb[4].mxu1 %vm310_vm0, %v1506_v10 }
  0x13   :  { %459 = vmatprep.mubr.bf16.mxu0 %v1561_v2  ;;  %812 = vmatprep.mubr.bf16.mxu1 %v1561_v2 }
  0x1a   :  { %1427 = vmatmul.mubr.msk.bf16.gmra.mrb[8].mxu0 %vm310_vm0, %v1507_v11  ;;  %1459 = vmatmul.mubr.msk.bf16.gmra.mrb[8].mxu1 %vm310_vm0, %v1507_v11 }
  0x1b   :  { %469 = vmatprep.mubr.bf16.mxu0 %v1561_v2  ;;  %822 = vmatprep.mubr.bf16.mxu1 %v1561_v2 }
  0x1c   :  { %8 = vsyncpa [#allocation3], 0  ;;  %v1509_v13 = vld [vmem:[%s2112_s0 + $0x20] sm:$0xff]   ;;  %v1510_v14 = vld [vmem:[%s2112_s0 + $0x28] sm:$0xff]   ;;  %v90_v35 = vlaneseq }
  0x1d   :  { %v1511_v15 = vld [vmem:[%s2112_s0 + $0x30] sm:$0xff]   ;;  %v1512_v16 = vld [vmem:[%s2112_s0 + $0x38] sm:$0xff]   ;;  %v1513_v17 = vld [vmem:[%s2112_s0 + $0x40] sm:$0xff]  }
  0x1e   :  { %v1514_v18 = vld [vmem:[%s2112_s0 + $0x48] sm:$0xff]   ;;  %v1515_v19 = vld [vmem:[%s2112_s0 + $0x50] sm:$0xff]   ;;  %v1516_v20 = vld [vmem:[%s2112_s0 + $0x58] sm:$0xff]   ;;  %v91_v36 = vshrl.u32 %v90_v35, 7 }
  0x1f   :  { %v1517_v21 = vld [vmem:[%s2112_s0 + $0x60] sm:$0xff]   ;;  %v1518_v22 = vld [vmem:[%s2112_s0 + $0x68] sm:$0xff]   ;;  %v1519_v23 = vld [vmem:[%s2112_s0 + $0x70] sm:$0xff]  }
  0x20   :  { %v1520_v24 = vld [vmem:[%s2112_s0 + $0x78] sm:$0xff]   ;;  %v1521_v25 = vld [vmem:[%s2112_s0 + $0x80] sm:$0xff]   ;;  %v1522_v26 = vld [vmem:[%s2112_s0 + $0x88] sm:$0xff]   ;;  %v92_v38 = vsub.s32 0, %v91_v36  ;;  %v100_v39 = vsub.s32 2, %v91_v36  ;;  %v96_v41 = vsub.s32 1, %v91_v36 }
  0x21   :  { %v1523_v27 = vld [vmem:[%s2112_s0 + $0x90] sm:$0xff]   ;;  %v1524_v28 = vld [vmem:[%s2112_s0 + $0x98] sm:$0xff]   ;;  %v1525_v29 = vld [vmem:[%s2112_s0 + $0xa0] sm:$0xff]   ;;  %v104_v42 = vsub.s32 3, %v91_v36 }
  0x22   :  { %1428 = vmatmul.mubr.msk.bf16.gmra.mrb[12].mxu0 %vm310_vm0, %v1508_v12  ;;  %1460 = vmatmul.mubr.msk.bf16.gmra.mrb[12].mxu1 %vm310_vm0, %v1508_v12  ;;  %v1526_v30 = vld [vmem:[%s2112_s0 + $0xa8] sm:$0xff]   ;;  %v1527_v31 = vld [vmem:[%s2112_s0 + $0xb0] sm:$0xff]   ;;  %v1528_v32 = vld [vmem:[%s2112_s0 + $0xb8] sm:$0xff]  }
  0x23   :  { %479 = vmatprep.mubr.bf16.mxu0 %v1561_v2  ;;  %832 = vmatprep.mubr.bf16.mxu1 %v1561_v2  ;;  %v1529_v33 = vld [vmem:[%s2112_s0 + $0xc0] sm:$0xff]   ;;  %v1530_v34 = vld [vmem:[%s2112_s0 + $0xc8] sm:$0xff]   ;;  %v1531_v37 = vld [vmem:[%s2112_s0 + $0xd0] sm:$0xff]  }
  0x24   :  { %v88_v40 = vld [vmem:[%s2114_s2] sm:$0xf]  ;;  %v1532_v53 = vld [vmem:[%s2112_s0 + $0xd8] sm:$0xff]  }
  0x25   :  { %v1801_v43 = vrot.slane %v88_v40, %v92_v38  ;;  %v1803_v44 = vrot.slane %v88_v40, %v100_v39  ;;  %v1805_v45 = vrot.slane %v88_v40, %v96_v41  ;;  %v1807_v46 = vrot.slane %v88_v40, %v104_v42  ;;  %v1533_v7 = vld [vmem:[%s2112_s0 + $0xe0] sm:$0xff]   ;;  %v1535_v41 = vld [vmem:[%s2112_s0 + $0xf0] sm:$0xff]  }
  0x2a   :  { %1429 = vmatmul.mubr.msk.bf16.gmra.mrb[16].mxu0 %vm310_vm0, %v1509_v13  ;;  %1461 = vmatmul.mubr.msk.bf16.gmra.mrb[16].mxu1 %vm310_vm0, %v1509_v13 }
  0x2b   :  { %489 = vmatprep.mubr.bf16.mxu0 %v1561_v2  ;;  %842 = vmatprep.mubr.bf16.mxu1 %v1561_v2 }
  0x32   :  { %1430 = vmatmul.mubr.msk.bf16.gmra.mrb[20].mxu0 %vm310_vm0, %v1510_v14  ;;  %1462 = vmatmul.mubr.msk.bf16.gmra.mrb[20].mxu1 %vm310_vm0, %v1510_v14 }
  0x33   :  { %499 = vmatprep.mubr.bf16.mxu0 %v1561_v2  ;;  %852 = vmatprep.mubr.bf16.mxu1 %v1561_v2 }
  0x3a   :  { %1431 = vmatmul.mubr.msk.bf16.gmra.mrb[24].mxu0 %vm310_vm0, %v1511_v15  ;;  %1463 = vmatmul.mubr.msk.bf16.gmra.mrb[24].mxu1 %vm310_vm0, %v1511_v15 }
  0x3b   :  { %509 = vmatprep.mubr.bf16.mxu0 %v1561_v2  ;;  %862 = vmatprep.mubr.bf16.mxu1 %v1561_v2 }
  0x42   :  { %1432 = vmatmul.mubr.msk.bf16.gmra.mrb[28].mxu0 %vm310_vm0, %v1512_v16  ;;  %1464 = vmatmul.mubr.msk.bf16.gmra.mrb[28].mxu1 %vm310_vm0, %v1512_v16 }
  0x43   :  { %519 = vmatprep.mubr.bf16.mxu0 %v1561_v2  ;;  %872 = vmatprep.mubr.bf16.mxu1 %v1561_v2 }
  0x4a   :  { %1433 = vmatmul.mubr.msk.bf16.gmra.mrb[32].mxu0 %vm310_vm0, %v1513_v17  ;;  %1465 = vmatmul.mubr.msk.bf16.gmra.mrb[32].mxu1 %vm310_vm0, %v1513_v17 }
  0x4b   :  { %529 = vmatprep.mubr.bf16.mxu0 %v1561_v2  ;;  %882 = vmatprep.mubr.bf16.mxu1 %v1561_v2 }
  0x52   :  { %1434 = vmatmul.mubr.msk.bf16.gmra.mrb[36].mxu0 %vm310_vm0, %v1514_v18  ;;  %1466 = vmatmul.mubr.msk.bf16.gmra.mrb[36].mxu1 %vm310_vm0, %v1514_v18 }
  0x53   :  { %539 = vmatprep.mubr.bf16.mxu0 %v1561_v2  ;;  %892 = vmatprep.mubr.bf16.mxu1 %v1561_v2 }
  0x5a   :  { %1435 = vmatmul.mubr.msk.bf16.gmra.mrb[40].mxu0 %vm310_vm0, %v1515_v19  ;;  %1467 = vmatmul.mubr.msk.bf16.gmra.mrb[40].mxu1 %vm310_vm0, %v1515_v19 }
  0x5b   :  { %549 = vmatprep.mubr.bf16.mxu0 %v1561_v2  ;;  %902 = vmatprep.mubr.bf16.mxu1 %v1561_v2 }
  0x62   :  { %1436 = vmatmul.mubr.msk.bf16.gmra.mrb[44].mxu0 %vm310_vm0, %v1516_v20  ;;  %1468 = vmatmul.mubr.msk.bf16.gmra.mrb[44].mxu1 %vm310_vm0, %v1516_v20 }
  0x63   :  { %559 = vmatprep.mubr.bf16.mxu0 %v1561_v2  ;;  %912 = vmatprep.mubr.bf16.mxu1 %v1561_v2 }
  0x6a   :  { %1437 = vmatmul.mubr.msk.bf16.gmra.mrb[48].mxu0 %vm310_vm0, %v1517_v21  ;;  %1469 = vmatmul.mubr.msk.bf16.gmra.mrb[48].mxu1 %vm310_vm0, %v1517_v21 }
  0x6b   :  { %569 = vmatprep.mubr.bf16.mxu0 %v1561_v2  ;;  %922 = vmatprep.mubr.bf16.mxu1 %v1561_v2 }
  0x72   :  { %1438 = vmatmul.mubr.msk.bf16.gmra.mrb[52].mxu0 %vm310_vm0, %v1518_v22  ;;  %1470 = vmatmul.mubr.msk.bf16.gmra.mrb[52].mxu1 %vm310_vm0, %v1518_v22 }
  0x73   :  { %579 = vmatprep.mubr.bf16.mxu0 %v1561_v2  ;;  %932 = vmatprep.mubr.bf16.mxu1 %v1561_v2 }
  0x7a   :  { %1439 = vmatmul.mubr.msk.bf16.gmra.mrb[56].mxu0 %vm310_vm0, %v1519_v23  ;;  %1471 = vmatmul.mubr.msk.bf16.gmra.mrb[56].mxu1 %vm310_vm0, %v1519_v23 }
  0x7b   :  { %589 = vmatprep.mubr.bf16.mxu0 %v1561_v2  ;;  %942 = vmatprep.mubr.bf16.mxu1 %v1561_v2 }
  0x82   :  { %1440 = vmatmul.mubr.msk.bf16.gmra.mrb[60].mxu0 %vm310_vm0, %v1520_v24  ;;  %1472 = vmatmul.mubr.msk.bf16.gmra.mrb[60].mxu1 %vm310_vm0, %v1520_v24  ;;  %v1534_v24 = vld [vmem:[%s2112_s0 + $0xe8] sm:$0xff]  }
  0x83   :  { %599 = vmatprep.mubr.bf16.mxu0 %v1561_v2  ;;  %952 = vmatprep.mubr.bf16.mxu1 %v1561_v2 }
  0x8a   :  { %1441 = vmatmul.mubr.msk.bf16.gmra.mrb[64].mxu0 %vm310_vm0, %v1521_v25  ;;  %1473 = vmatmul.mubr.msk.bf16.gmra.mrb[64].mxu1 %vm310_vm0, %v1521_v25 }
  0x8b   :  { %609 = vmatprep.mubr.bf16.mxu0 %v1561_v2  ;;  %962 = vmatprep.mubr.bf16.mxu1 %v1561_v2 }
  0x92   :  { %1442 = vmatmul.mubr.msk.bf16.gmra.mrb[68].mxu0 %vm310_vm0, %v1522_v26  ;;  %1474 = vmatmul.mubr.msk.bf16.gmra.mrb[68].mxu1 %vm310_vm0, %v1522_v26 }
  0x93   :  { %619 = vmatprep.mubr.bf16.mxu0 %v1561_v2  ;;  %972 = vmatprep.mubr.bf16.mxu1 %v1561_v2 }
  0x9a   :  { %1443 = vmatmul.mubr.msk.bf16.gmra.mrb[72].mxu0 %vm310_vm0, %v1523_v27  ;;  %1475 = vmatmul.mubr.msk.bf16.gmra.mrb[72].mxu1 %vm310_vm0, %v1523_v27 }
  0x9b   :  { %629 = vmatprep.mubr.bf16.mxu0 %v1561_v2  ;;  %982 = vmatprep.mubr.bf16.mxu1 %v1561_v2 }
  0xa2   :  { %1444 = vmatmul.mubr.msk.bf16.gmra.mrb[76].mxu0 %vm310_vm0, %v1524_v28  ;;  %1476 = vmatmul.mubr.msk.bf16.gmra.mrb[76].mxu1 %vm310_vm0, %v1524_v28 }
  0xa3   :  { %639 = vmatprep.mubr.bf16.mxu0 %v1561_v2  ;;  %992 = vmatprep.mubr.bf16.mxu1 %v1561_v2 }
  0xaa   :  { %1445 = vmatmul.mubr.msk.bf16.gmra.mrb[80].mxu0 %vm310_vm0, %v1525_v29  ;;  %1477 = vmatmul.mubr.msk.bf16.gmra.mrb[80].mxu1 %vm310_vm0, %v1525_v29 }
  0xab   :  { %649 = vmatprep.mubr.bf16.mxu0 %v1561_v2  ;;  %1002 = vmatprep.mubr.bf16.mxu1 %v1561_v2 }
  0xb2   :  { %1446 = vmatmul.mubr.msk.bf16.gmra.mrb[84].mxu0 %vm310_vm0, %v1526_v30  ;;  %1478 = vmatmul.mubr.msk.bf16.gmra.mrb[84].mxu1 %vm310_vm0, %v1526_v30 }
  0xb3   :  { %659 = vmatprep.mubr.bf16.mxu0 %v1561_v2  ;;  %1012 = vmatprep.mubr.bf16.mxu1 %v1561_v2 }
  0xba   :  { %1447 = vmatmul.mubr.msk.bf16.gmra.mrb[88].mxu0 %vm310_vm0, %v1527_v31  ;;  %1479 = vmatmul.mubr.msk.bf16.gmra.mrb[88].mxu1 %vm310_vm0, %v1527_v31 }
  0xbb   :  { %669 = vmatprep.mubr.bf16.mxu0 %v1561_v2  ;;  %1022 = vmatprep.mubr.bf16.mxu1 %v1561_v2 }
  0xc2   :  { %1448 = vmatmul.mubr.msk.bf16.gmra.mrb[92].mxu0 %vm310_vm0, %v1528_v32  ;;  %1480 = vmatmul.mubr.msk.bf16.gmra.mrb[92].mxu1 %vm310_vm0, %v1528_v32 }
  0xc3   :  { %679 = vmatprep.mubr.bf16.mxu0 %v1561_v2  ;;  %1032 = vmatprep.mubr.bf16.mxu1 %v1561_v2 }
  0xca   :  { %1449 = vmatmul.mubr.msk.bf16.gmra.mrb[96].mxu0 %vm310_vm0, %v1529_v33  ;;  %1481 = vmatmul.mubr.msk.bf16.gmra.mrb[96].mxu1 %vm310_vm0, %v1529_v33 }
  0xcb   :  { %689 = vmatprep.mubr.bf16.mxu0 %v1561_v2  ;;  %1042 = vmatprep.mubr.bf16.mxu1 %v1561_v2 }
  0xd2   :  { %1450 = vmatmul.mubr.msk.bf16.gmra.mrb[100].mxu0 %vm310_vm0, %v1530_v34  ;;  %1482 = vmatmul.mubr.msk.bf16.gmra.mrb[100].mxu1 %vm310_vm0, %v1530_v34 }
  0xd3   :  { %699 = vmatprep.mubr.bf16.mxu0 %v1561_v2  ;;  %1052 = vmatprep.mubr.bf16.mxu1 %v1561_v2 }
  0xda   :  { %1451 = vmatmul.mubr.msk.bf16.gmra.mrb[104].mxu0 %vm310_vm0, %v1531_v37  ;;  %1483 = vmatmul.mubr.msk.bf16.gmra.mrb[104].mxu1 %vm310_vm0, %v1531_v37 }
  0xdb   :  { %709 = vmatprep.mubr.bf16.mxu0 %v1561_v2  ;;  %1062 = vmatprep.mubr.bf16.mxu1 %v1561_v2 }
  0xdd   :  { %v441_v47 = vpop.f32.mrb[0].mxu0  ;;  %v794_v48 = vpop.f32.mrb[0].mxu1 }
  0xde   :  { %v442_v49 = vadd.f32 %v441_v47, %v1801_v43  ;;  %v795_v50 = vadd.f32 %v794_v48, %v1803_v44  ;;  %v443_v51 = vpop.f32.mrb[1].mxu0  ;;  %v796_v52 = vpop.f32.mrb[1].mxu1 }
  0xdf   :  { %v444_v54 = vadd.f32 %v443_v51, %v1805_v45  ;;  %v797_v55 = vadd.f32 %v796_v52, %v1807_v46  ;;  %v445_v56 = vpop.f32.mrb[2].mxu0  ;;  %v798_v57 = vpop.f32.mrb[2].mxu1 }
  0xe0   :  { %1113 = vst [vmem:[#allocation2] sm:$0xff] %v442_v49  ;;  %1115 = vst [vmem:[#allocation2 + $0x10] sm:$0xff] %v795_v50  ;;  %v446_v58 = vadd.f32 %v445_v56, %v1801_v43  ;;  %v799_v59 = vadd.f32 %v798_v57, %v1803_v44  ;;  %v447_v60 = vpop.f32.mrb[3].mxu0  ;;  %v800_v61 = vpop.f32.mrb[3].mxu1 }
  0xe1   :  { %1114 = vst [vmem:[#allocation2 + $0x8] sm:$0xff] %v444_v54  ;;  %1116 = vst [vmem:[#allocation2 + $0x18] sm:$0xff] %v797_v55  ;;  %v448_v62 = vadd.f32 %v447_v60, %v1805_v45  ;;  %v801_v63 = vadd.f32 %v800_v61, %v1807_v46 }
  0xe2   :  { %1117 = vst [vmem:[#allocation2 + $0x20] sm:$0xff] %v446_v58  ;;  %1119 = vst [vmem:[#allocation2 + $0x30] sm:$0xff] %v799_v59  ;;  %1452 = vmatmul.mubr.msk.bf16.gmra.mrb[108].mxu0 %vm310_vm0, %v1532_v53  ;;  %1484 = vmatmul.mubr.msk.bf16.gmra.mrb[108].mxu1 %vm310_vm0, %v1532_v53 }
  0xe3   :  { %1118 = vst [vmem:[#allocation2 + $0x28] sm:$0xff] %v448_v62  ;;  %1120 = vst [vmem:[#allocation2 + $0x38] sm:$0xff] %v801_v63  ;;  %719 = vmatprep.mubr.bf16.mxu0 %v1561_v2  ;;  %1072 = vmatprep.mubr.bf16.mxu1 %v1561_v2  ;;  %v1536_v62 = vld [vmem:[%s2112_s0 + $0xf8] sm:$0xff]   ;;  %s1562_s0 = smov [#allocation2]  }
  0xe4   :  { %s1374_s9 = sshll.u32 %s1562_s0, 4  ;;  %s1375_s9 = int_to_ptr.vmem [resolvable:$true] %s1374_s9 }
  0xe5   :  { %v451_v0 = vpop.f32.mrb[4].mxu0  ;;  %v804_v1 = vpop.f32.mrb[4].mxu1  ;;  %s1537_s10 = scalar_lea.vmem %s1375_s9, 32768  ;;  %p1542_p1 = scmp.lt.s32.totalorder %s1375_s9, %s1375_s9 }
  0xe6   :  { %v452_v3 = vadd.f32 %v451_v0, %v1801_v43  ;;  %v805_v4 = vadd.f32 %v804_v1, %v1803_v44  ;;  %v453_v5 = vpop.f32.mrb[5].mxu0  ;;  %v806_v6 = vpop.f32.mrb[5].mxu1  ;;  %p1538_p0 = scmp.ne.s32.totalorder %s1375_s9, %s1537_s10  ;;  %p1543_p2 = scmp.lt.s32.totalorder %s1537_s10, %s1537_s10 }
  0xe7   :  { %v454_v8 = vadd.f32 %v453_v5, %v1805_v45  ;;  %v807_v9 = vadd.f32 %v806_v6, %v1807_v46  ;;  %v455_v10 = vpop.f32.mrb[6].mxu0  ;;  %v808_v11 = vpop.f32.mrb[6].mxu1 }
  0xe8   :  { %1121 = vst [vmem:[#allocation2 + $0x40] sm:$0xff] %v452_v3  ;;  %1123 = vst [vmem:[#allocation2 + $0x50] sm:$0xff] %v805_v4  ;;  %v456_v12 = vadd.f32 %v455_v10, %v1801_v43  ;;  %v809_v13 = vadd.f32 %v808_v11, %v1803_v44  ;;  %v457_v14 = vpop.f32.mrb[7].mxu0  ;;  %v810_v15 = vpop.f32.mrb[7].mxu1  ;;  %p1544_p3 = por %p1543_p2, %p1542_p1 }
  0xe9   :  { %1122 = vst [vmem:[#allocation2 + $0x48] sm:$0xff] %v454_v8  ;;  %1124 = vst [vmem:[#allocation2 + $0x58] sm:$0xff] %v807_v9  ;;  %v458_v16 = vadd.f32 %v457_v14, %v1805_v45  ;;  %v811_v17 = vadd.f32 %v810_v15, %v1807_v46 }
  0xea   :  { %1125 = vst [vmem:[#allocation2 + $0x60] sm:$0xff] %v456_v12  ;;  %1127 = vst [vmem:[#allocation2 + $0x70] sm:$0xff] %v809_v13  ;;  %1453 = vmatmul.mubr.msk.bf16.gmra.mrb[112].mxu0 %vm310_vm0, %v1533_v7  ;;  %1485 = vmatmul.mubr.msk.bf16.gmra.mrb[112].mxu1 %vm310_vm0, %v1533_v7  ;;  %p1545_p4 = pnand %p1544_p3, %p1538_p0 }
  0xeb   :  { %1126 = vst [vmem:[#allocation2 + $0x68] sm:$0xff] %v458_v16  ;;  %1128 = vst [vmem:[#allocation2 + $0x78] sm:$0xff] %v811_v17  ;;  %729 = vmatprep.mubr.bf16.mxu0 %v1561_v2  ;;  %1082 = vmatprep.mubr.bf16.mxu1 %v1561_v2 }
  0xed   :  { %v461_v18 = vpop.f32.mrb[8].mxu0  ;;  %v814_v19 = vpop.f32.mrb[8].mxu1 }
  0xee   :  { %v462_v20 = vadd.f32 %v461_v18, %v1801_v43  ;;  %v815_v21 = vadd.f32 %v814_v19, %v1803_v44  ;;  %v463_v22 = vpop.f32.mrb[9].mxu0  ;;  %v816_v23 = vpop.f32.mrb[9].mxu1 }
  0xef   :  { %v464_v25 = vadd.f32 %v463_v22, %v1805_v45  ;;  %v817_v26 = vadd.f32 %v816_v23, %v1807_v46  ;;  %v465_v27 = vpop.f32.mrb[10].mxu0  ;;  %v818_v28 = vpop.f32.mrb[10].mxu1 }
  0xf0   :  { %1129 = vst [vmem:[#allocation2 + $0x80] sm:$0xff] %v462_v20  ;;  %1131 = vst [vmem:[#allocation2 + $0x90] sm:$0xff] %v815_v21  ;;  %v466_v29 = vadd.f32 %v465_v27, %v1801_v43  ;;  %v819_v30 = vadd.f32 %v818_v28, %v1803_v44  ;;  %v467_v31 = vpop.f32.mrb[11].mxu0  ;;  %v820_v32 = vpop.f32.mrb[11].mxu1 }
  0xf1   :  { %1130 = vst [vmem:[#allocation2 + $0x88] sm:$0xff] %v464_v25  ;;  %1132 = vst [vmem:[#allocation2 + $0x98] sm:$0xff] %v817_v26  ;;  %v468_v33 = vadd.f32 %v467_v31, %v1805_v45  ;;  %v821_v34 = vadd.f32 %v820_v32, %v1807_v46 }
  0xf2   :  { %1133 = vst [vmem:[#allocation2 + $0xa0] sm:$0xff] %v466_v29  ;;  %1135 = vst [vmem:[#allocation2 + $0xb0] sm:$0xff] %v819_v30  ;;  %1454 = vmatmul.mubr.msk.bf16.gmra.mrb[116].mxu0 %vm310_vm0, %v1534_v24  ;;  %1486 = vmatmul.mubr.msk.bf16.gmra.mrb[116].mxu1 %vm310_vm0, %v1534_v24 }
  0xf3   :  { %1134 = vst [vmem:[#allocation2 + $0xa8] sm:$0xff] %v468_v33  ;;  %1136 = vst [vmem:[#allocation2 + $0xb8] sm:$0xff] %v821_v34  ;;  %739 = vmatprep.mubr.bf16.mxu0 %v1561_v2  ;;  %1092 = vmatprep.mubr.bf16.mxu1 %v1561_v2 }
  0xf5   :  { %v471_v35 = vpop.f32.mrb[12].mxu0  ;;  %v824_v36 = vpop.f32.mrb[12].mxu1 }
  0xf6   :  { %v472_v37 = vadd.f32 %v471_v35, %v1801_v43  ;;  %v825_v38 = vadd.f32 %v824_v36, %v1803_v44  ;;  %v473_v39 = vpop.f32.mrb[13].mxu0  ;;  %v826_v40 = vpop.f32.mrb[13].mxu1 }
  0xf7   :  { %v474_v42 = vadd.f32 %v473_v39, %v1805_v45  ;;  %v827_v47 = vadd.f32 %v826_v40, %v1807_v46  ;;  %v475_v48 = vpop.f32.mrb[14].mxu0  ;;  %v828_v49 = vpop.f32.mrb[14].mxu1 }
  0xf8   :  { %1137 = vst [vmem:[#allocation2 + $0xc0] sm:$0xff] %v472_v37  ;;  %1139 = vst [vmem:[#allocation2 + $0xd0] sm:$0xff] %v825_v38  ;;  %v476_v50 = vadd.f32 %v475_v48, %v1801_v43  ;;  %v829_v51 = vadd.f32 %v828_v49, %v1803_v44  ;;  %v477_v52 = vpop.f32.mrb[15].mxu0  ;;  %v830_v53 = vpop.f32.mrb[15].mxu1 }
  0xf9   :  { %1138 = vst [vmem:[#allocation2 + $0xc8] sm:$0xff] %v474_v42  ;;  %1140 = vst [vmem:[#allocation2 + $0xd8] sm:$0xff] %v827_v47  ;;  %v478_v54 = vadd.f32 %v477_v52, %v1805_v45  ;;  %v831_v55 = vadd.f32 %v830_v53, %v1807_v46 }
  0xfa   :  { %1141 = vst [vmem:[#allocation2 + $0xe0] sm:$0xff] %v476_v50  ;;  %1143 = vst [vmem:[#allocation2 + $0xf0] sm:$0xff] %v829_v51  ;;  %1455 = vmatmul.mubr.msk.bf16.gmra.mrb[120].mxu0 %vm310_vm0, %v1535_v41  ;;  %1487 = vmatmul.mubr.msk.bf16.gmra.mrb[120].mxu1 %vm310_vm0, %v1535_v41 }
  0xfb   :  { %1142 = vst [vmem:[#allocation2 + $0xe8] sm:$0xff] %v478_v54  ;;  %1144 = vst [vmem:[#allocation2 + $0xf8] sm:$0xff] %v831_v55  ;;  %749 = vmatprep.mubr.bf16.mxu0 %v1561_v2  ;;  %1102 = vmatprep.mubr.bf16.mxu1 %v1561_v2 }
  0xfd   :  { %v481_v56 = vpop.f32.mrb[16].mxu0  ;;  %v834_v57 = vpop.f32.mrb[16].mxu1 }
  0xfe   :  { %v482_v58 = vadd.f32 %v481_v56, %v1801_v43  ;;  %v835_v59 = vadd.f32 %v834_v57, %v1803_v44  ;;  %v483_v60 = vpop.f32.mrb[17].mxu0  ;;  %v836_v61 = vpop.f32.mrb[17].mxu1 }
  0xff   :  { %v484_v63 = vadd.f32 %v483_v60, %v1805_v45  ;;  %v837_v0 = vadd.f32 %v836_v61, %v1807_v46  ;;  %v485_v1 = vpop.f32.mrb[18].mxu0  ;;  %v838_v3 = vpop.f32.mrb[18].mxu1 }
 0x100   :  { %1145 = vst [vmem:[#allocation2 + $0x100] sm:$0xff] %v482_v58  ;;  %1147 = vst [vmem:[#allocation2 + $0x110] sm:$0xff] %v835_v59  ;;  %v486_v2 = vadd.f32 %v485_v1, %v1801_v43  ;;  %v839_v4 = vadd.f32 %v838_v3, %v1803_v44  ;;  %v487_v5 = vpop.f32.mrb[19].mxu0  ;;  %v840_v6 = vpop.f32.mrb[19].mxu1 }
 0x101   :  { %1146 = vst [vmem:[#allocation2 + $0x108] sm:$0xff] %v484_v63  ;;  %1148 = vst [vmem:[#allocation2 + $0x118] sm:$0xff] %v837_v0  ;;  %v488_v7 = vadd.f32 %v487_v5, %v1805_v45  ;;  %v841_v8 = vadd.f32 %v840_v6, %v1807_v46 }
 0x102   :  { %1149 = vst [vmem:[#allocation2 + $0x120] sm:$0xff] %v486_v2  ;;  %1151 = vst [vmem:[#allocation2 + $0x130] sm:$0xff] %v839_v4  ;;  %1456 = vmatmul.mubr.msk.bf16.gmra.mrb[124].mxu0 %vm310_vm0, %v1536_v62  ;;  %1488 = vmatmul.mubr.msk.bf16.gmra.mrb[124].mxu1 %vm310_vm0, %v1536_v62 }
 0x103   :  { %1150 = vst [vmem:[#allocation2 + $0x128] sm:$0xff] %v488_v7  ;;  %1152 = vst [vmem:[#allocation2 + $0x138] sm:$0xff] %v841_v8 }
 0x105   :  { %v491_v9 = vpop.f32.mrb[20].mxu0  ;;  %v844_v10 = vpop.f32.mrb[20].mxu1 }
 0x106   :  { %v492_v11 = vadd.f32 %v491_v9, %v1801_v43  ;;  %v845_v12 = vadd.f32 %v844_v10, %v1803_v44  ;;  %v493_v13 = vpop.f32.mrb[21].mxu0  ;;  %v846_v14 = vpop.f32.mrb[21].mxu1 }
 0x107   :  { %v494_v15 = vadd.f32 %v493_v13, %v1805_v45  ;;  %v847_v16 = vadd.f32 %v846_v14, %v1807_v46  ;;  %v495_v17 = vpop.f32.mrb[22].mxu0  ;;  %v848_v18 = vpop.f32.mrb[22].mxu1 }
 0x108   :  { %1153 = vst [vmem:[#allocation2 + $0x140] sm:$0xff] %v492_v11  ;;  %1155 = vst [vmem:[#allocation2 + $0x150] sm:$0xff] %v845_v12  ;;  %v496_v19 = vadd.f32 %v495_v17, %v1801_v43  ;;  %v849_v20 = vadd.f32 %v848_v18, %v1803_v44  ;;  %v497_v21 = vpop.f32.mrb[23].mxu0  ;;  %v850_v22 = vpop.f32.mrb[23].mxu1 }
 0x109   :  { %1154 = vst [vmem:[#allocation2 + $0x148] sm:$0xff] %v494_v15  ;;  %1156 = vst [vmem:[#allocation2 + $0x158] sm:$0xff] %v847_v16  ;;  %v498_v23 = vadd.f32 %v497_v21, %v1805_v45  ;;  %v851_v24 = vadd.f32 %v850_v22, %v1807_v46 }
 0x10a   :  { %1157 = vst [vmem:[#allocation2 + $0x160] sm:$0xff] %v496_v19  ;;  %1159 = vst [vmem:[#allocation2 + $0x170] sm:$0xff] %v849_v20 }
 0x10b   :  { %1158 = vst [vmem:[#allocation2 + $0x168] sm:$0xff] %v498_v23  ;;  %1160 = vst [vmem:[#allocation2 + $0x178] sm:$0xff] %v851_v24 }
 0x10d   :  { %v501_v25 = vpop.f32.mrb[24].mxu0  ;;  %v854_v26 = vpop.f32.mrb[24].mxu1 }
 0x10e   :  { %v502_v27 = vadd.f32 %v501_v25, %v1801_v43  ;;  %v855_v28 = vadd.f32 %v854_v26, %v1803_v44  ;;  %v503_v29 = vpop.f32.mrb[25].mxu0  ;;  %v856_v30 = vpop.f32.mrb[25].mxu1 }
 0x10f   :  { %v504_v31 = vadd.f32 %v503_v29, %v1805_v45  ;;  %v857_v32 = vadd.f32 %v856_v30, %v1807_v46  ;;  %v505_v33 = vpop.f32.mrb[26].mxu0  ;;  %v858_v34 = vpop.f32.mrb[26].mxu1 }
 0x110   :  { %1161 = vst [vmem:[#allocation2 + $0x180] sm:$0xff] %v502_v27  ;;  %1163 = vst [vmem:[#allocation2 + $0x190] sm:$0xff] %v855_v28  ;;  %v506_v35 = vadd.f32 %v505_v33, %v1801_v43  ;;  %v859_v36 = vadd.f32 %v858_v34, %v1803_v44  ;;  %v507_v37 = vpop.f32.mrb[27].mxu0  ;;  %v860_v38 = vpop.f32.mrb[27].mxu1 }
 0x111   :  { %1162 = vst [vmem:[#allocation2 + $0x188] sm:$0xff] %v504_v31  ;;  %1164 = vst [vmem:[#allocation2 + $0x198] sm:$0xff] %v857_v32  ;;  %v508_v39 = vadd.f32 %v507_v37, %v1805_v45  ;;  %v861_v40 = vadd.f32 %v860_v38, %v1807_v46 }
 0x112   :  { %1165 = vst [vmem:[#allocation2 + $0x1a0] sm:$0xff] %v506_v35  ;;  %1167 = vst [vmem:[#allocation2 + $0x1b0] sm:$0xff] %v859_v36 }
 0x113   :  { %1166 = vst [vmem:[#allocation2 + $0x1a8] sm:$0xff] %v508_v39  ;;  %1168 = vst [vmem:[#allocation2 + $0x1b8] sm:$0xff] %v861_v40 }
 0x115   :  { %v511_v41 = vpop.f32.mrb[28].mxu0  ;;  %v864_v42 = vpop.f32.mrb[28].mxu1 }
 0x116   :  { %v512_v47 = vadd.f32 %v511_v41, %v1801_v43  ;;  %v865_v48 = vadd.f32 %v864_v42, %v1803_v44  ;;  %v513_v49 = vpop.f32.mrb[29].mxu0  ;;  %v866_v50 = vpop.f32.mrb[29].mxu1 }
 0x117   :  { %v514_v51 = vadd.f32 %v513_v49, %v1805_v45  ;;  %v867_v52 = vadd.f32 %v866_v50, %v1807_v46  ;;  %v515_v53 = vpop.f32.mrb[30].mxu0  ;;  %v868_v54 = vpop.f32.mrb[30].mxu1 }
 0x118   :  { %1169 = vst [vmem:[#allocation2 + $0x1c0] sm:$0xff] %v512_v47  ;;  %1171 = vst [vmem:[#allocation2 + $0x1d0] sm:$0xff] %v865_v48  ;;  %v516_v55 = vadd.f32 %v515_v53, %v1801_v43  ;;  %v869_v56 = vadd.f32 %v868_v54, %v1803_v44  ;;  %v517_v57 = vpop.f32.mrb[31].mxu0  ;;  %v870_v58 = vpop.f32.mrb[31].mxu1 }
 0x119   :  { %1170 = vst [vmem:[#allocation2 + $0x1c8] sm:$0xff] %v514_v51  ;;  %1172 = vst [vmem:[#allocation2 + $0x1d8] sm:$0xff] %v867_v52  ;;  %v518_v59 = vadd.f32 %v517_v57, %v1805_v45  ;;  %v871_v60 = vadd.f32 %v870_v58, %v1807_v46 }
 0x11a   :  { %1173 = vst [vmem:[#allocation2 + $0x1e0] sm:$0xff] %v516_v55  ;;  %1175 = vst [vmem:[#allocation2 + $0x1f0] sm:$0xff] %v869_v56 }
 0x11b   :  { %1174 = vst [vmem:[#allocation2 + $0x1e8] sm:$0xff] %v518_v59  ;;  %1176 = vst [vmem:[#allocation2 + $0x1f8] sm:$0xff] %v871_v60 }
 0x11d   :  { %v521_v61 = vpop.f32.mrb[32].mxu0  ;;  %v874_v62 = vpop.f32.mrb[32].mxu1 }
 0x11e   :  { %v522_v63 = vadd.f32 %v521_v61, %v1801_v43  ;;  %v875_v0 = vadd.f32 %v874_v62, %v1803_v44  ;;  %v523_v1 = vpop.f32.mrb[33].mxu0  ;;  %v876_v3 = vpop.f32.mrb[33].mxu1 }
 0x11f   :  { %v524_v2 = vadd.f32 %v523_v1, %v1805_v45  ;;  %v877_v4 = vadd.f32 %v876_v3, %v1807_v46  ;;  %v525_v5 = vpop.f32.mrb[34].mxu0  ;;  %v878_v6 = vpop.f32.mrb[34].mxu1 }
 0x120   :  { %1177 = vst [vmem:[#allocation2 + $0x200] sm:$0xff] %v522_v63  ;;  %1179 = vst [vmem:[#allocation2 + $0x210] sm:$0xff] %v875_v0  ;;  %v526_v7 = vadd.f32 %v525_v5, %v1801_v43  ;;  %v879_v8 = vadd.f32 %v878_v6, %v1803_v44  ;;  %v527_v9 = vpop.f32.mrb[35].mxu0  ;;  %v880_v10 = vpop.f32.mrb[35].mxu1 }
 0x121   :  { %1178 = vst [vmem:[#allocation2 + $0x208] sm:$0xff] %v524_v2  ;;  %1180 = vst [vmem:[#allocation2 + $0x218] sm:$0xff] %v877_v4  ;;  %v528_v11 = vadd.f32 %v527_v9, %v1805_v45  ;;  %v881_v12 = vadd.f32 %v880_v10, %v1807_v46 }
 0x122   :  { %1181 = vst [vmem:[#allocation2 + $0x220] sm:$0xff] %v526_v7  ;;  %1183 = vst [vmem:[#allocation2 + $0x230] sm:$0xff] %v879_v8 }
 0x123   :  { %1182 = vst [vmem:[#allocation2 + $0x228] sm:$0xff] %v528_v11  ;;  %1184 = vst [vmem:[#allocation2 + $0x238] sm:$0xff] %v881_v12 }
 0x125   :  { %v531_v13 = vpop.f32.mrb[36].mxu0  ;;  %v884_v14 = vpop.f32.mrb[36].mxu1 }
 0x126   :  { %v532_v15 = vadd.f32 %v531_v13, %v1801_v43  ;;  %v885_v16 = vadd.f32 %v884_v14, %v1803_v44  ;;  %v533_v17 = vpop.f32.mrb[37].mxu0  ;;  %v886_v18 = vpop.f32.mrb[37].mxu1 }
 0x127   :  { %v534_v19 = vadd.f32 %v533_v17, %v1805_v45  ;;  %v887_v20 = vadd.f32 %v886_v18, %v1807_v46  ;;  %v535_v21 = vpop.f32.mrb[38].mxu0  ;;  %v888_v22 = vpop.f32.mrb[38].mxu1 }
 0x128   :  { %1185 = vst [vmem:[#allocation2 + $0x240] sm:$0xff] %v532_v15  ;;  %1187 = vst [vmem:[#allocation2 + $0x250] sm:$0xff] %v885_v16  ;;  %v536_v23 = vadd.f32 %v535_v21, %v1801_v43  ;;  %v889_v24 = vadd.f32 %v888_v22, %v1803_v44  ;;  %v537_v25 = vpop.f32.mrb[39].mxu0  ;;  %v890_v26 = vpop.f32.mrb[39].mxu1 }
 0x129   :  { %1186 = vst [vmem:[#allocation2 + $0x248] sm:$0xff] %v534_v19  ;;  %1188 = vst [vmem:[#allocation2 + $0x258] sm:$0xff] %v887_v20  ;;  %v538_v27 = vadd.f32 %v537_v25, %v1805_v45  ;;  %v891_v28 = vadd.f32 %v890_v26, %v1807_v46 }
 0x12a   :  { %1189 = vst [vmem:[#allocation2 + $0x260] sm:$0xff] %v536_v23  ;;  %1191 = vst [vmem:[#allocation2 + $0x270] sm:$0xff] %v889_v24 }
 0x12b   :  { %1190 = vst [vmem:[#allocation2 + $0x268] sm:$0xff] %v538_v27  ;;  %1192 = vst [vmem:[#allocation2 + $0x278] sm:$0xff] %v891_v28 }
 0x12d   :  { %v541_v29 = vpop.f32.mrb[40].mxu0  ;;  %v894_v30 = vpop.f32.mrb[40].mxu1 }
 0x12e   :  { %v542_v31 = vadd.f32 %v541_v29, %v1801_v43  ;;  %v895_v32 = vadd.f32 %v894_v30, %v1803_v44  ;;  %v543_v33 = vpop.f32.mrb[41].mxu0  ;;  %v896_v34 = vpop.f32.mrb[41].mxu1 }
 0x12f   :  { %v544_v35 = vadd.f32 %v543_v33, %v1805_v45  ;;  %v897_v36 = vadd.f32 %v896_v34, %v1807_v46  ;;  %v545_v37 = vpop.f32.mrb[42].mxu0  ;;  %v898_v38 = vpop.f32.mrb[42].mxu1 }
 0x130   :  { %1193 = vst [vmem:[#allocation2 + $0x280] sm:$0xff] %v542_v31  ;;  %1195 = vst [vmem:[#allocation2 + $0x290] sm:$0xff] %v895_v32  ;;  %v546_v39 = vadd.f32 %v545_v37, %v1801_v43  ;;  %v899_v40 = vadd.f32 %v898_v38, %v1803_v44  ;;  %v547_v41 = vpop.f32.mrb[43].mxu0  ;;  %v900_v42 = vpop.f32.mrb[43].mxu1 }
 0x131   :  { %1194 = vst [vmem:[#allocation2 + $0x288] sm:$0xff] %v544_v35  ;;  %1196 = vst [vmem:[#allocation2 + $0x298] sm:$0xff] %v897_v36  ;;  %v548_v47 = vadd.f32 %v547_v41, %v1805_v45  ;;  %v901_v48 = vadd.f32 %v900_v42, %v1807_v46 }
 0x132   :  { %1197 = vst [vmem:[#allocation2 + $0x2a0] sm:$0xff] %v546_v39  ;;  %1199 = vst [vmem:[#allocation2 + $0x2b0] sm:$0xff] %v899_v40 }
 0x133   :  { %1198 = vst [vmem:[#allocation2 + $0x2a8] sm:$0xff] %v548_v47  ;;  %1200 = vst [vmem:[#allocation2 + $0x2b8] sm:$0xff] %v901_v48 }
 0x135   :  { %v551_v49 = vpop.f32.mrb[44].mxu0  ;;  %v904_v50 = vpop.f32.mrb[44].mxu1 }
 0x136   :  { %v552_v51 = vadd.f32 %v551_v49, %v1801_v43  ;;  %v905_v52 = vadd.f32 %v904_v50, %v1803_v44  ;;  %v553_v53 = vpop.f32.mrb[45].mxu0  ;;  %v906_v54 = vpop.f32.mrb[45].mxu1 }
 0x137   :  { %v554_v55 = vadd.f32 %v553_v53, %v1805_v45  ;;  %v907_v56 = vadd.f32 %v906_v54, %v1807_v46  ;;  %v555_v57 = vpop.f32.mrb[46].mxu0  ;;  %v908_v58 = vpop.f32.mrb[46].mxu1 }
 0x138   :  { %1201 = vst [vmem:[#allocation2 + $0x2c0] sm:$0xff] %v552_v51  ;;  %1203 = vst [vmem:[#allocation2 + $0x2d0] sm:$0xff] %v905_v52  ;;  %v556_v59 = vadd.f32 %v555_v57, %v1801_v43  ;;  %v909_v60 = vadd.f32 %v908_v58, %v1803_v44  ;;  %v557_v61 = vpop.f32.mrb[47].mxu0  ;;  %v910_v62 = vpop.f32.mrb[47].mxu1 }
 0x139   :  { %1202 = vst [vmem:[#allocation2 + $0x2c8] sm:$0xff] %v554_v55  ;;  %1204 = vst [vmem:[#allocation2 + $0x2d8] sm:$0xff] %v907_v56  ;;  %v558_v63 = vadd.f32 %v557_v61, %v1805_v45  ;;  %v911_v0 = vadd.f32 %v910_v62, %v1807_v46 }
 0x13a   :  { %1205 = vst [vmem:[#allocation2 + $0x2e0] sm:$0xff] %v556_v59  ;;  %1207 = vst [vmem:[#allocation2 + $0x2f0] sm:$0xff] %v909_v60 }
 0x13b   :  { %1206 = vst [vmem:[#allocation2 + $0x2e8] sm:$0xff] %v558_v63  ;;  %1208 = vst [vmem:[#allocation2 + $0x2f8] sm:$0xff] %v911_v0 }
 0x13d   :  { %v561_v1 = vpop.f32.mrb[48].mxu0  ;;  %v914_v3 = vpop.f32.mrb[48].mxu1 }
 0x13e   :  { %v562_v2 = vadd.f32 %v561_v1, %v1801_v43  ;;  %v915_v4 = vadd.f32 %v914_v3, %v1803_v44  ;;  %v563_v5 = vpop.f32.mrb[49].mxu0  ;;  %v916_v6 = vpop.f32.mrb[49].mxu1 }
 0x13f   :  { %v564_v7 = vadd.f32 %v563_v5, %v1805_v45  ;;  %v917_v8 = vadd.f32 %v916_v6, %v1807_v46  ;;  %v565_v9 = vpop.f32.mrb[50].mxu0  ;;  %v918_v10 = vpop.f32.mrb[50].mxu1 }
 0x140   :  { %1209 = vst [vmem:[#allocation2 + $0x300] sm:$0xff] %v562_v2  ;;  %1211 = vst [vmem:[#allocation2 + $0x310] sm:$0xff] %v915_v4  ;;  %v566_v11 = vadd.f32 %v565_v9, %v1801_v43  ;;  %v919_v12 = vadd.f32 %v918_v10, %v1803_v44  ;;  %v567_v13 = vpop.f32.mrb[51].mxu0  ;;  %v920_v14 = vpop.f32.mrb[51].mxu1 }
 0x141   :  { %1210 = vst [vmem:[#allocation2 + $0x308] sm:$0xff] %v564_v7  ;;  %1212 = vst [vmem:[#allocation2 + $0x318] sm:$0xff] %v917_v8  ;;  %v568_v15 = vadd.f32 %v567_v13, %v1805_v45  ;;  %v921_v16 = vadd.f32 %v920_v14, %v1807_v46 }
 0x142   :  { %1213 = vst [vmem:[#allocation2 + $0x320] sm:$0xff] %v566_v11  ;;  %1215 = vst [vmem:[#allocation2 + $0x330] sm:$0xff] %v919_v12 }
 0x143   :  { %1214 = vst [vmem:[#allocation2 + $0x328] sm:$0xff] %v568_v15  ;;  %1216 = vst [vmem:[#allocation2 + $0x338] sm:$0xff] %v921_v16 }
 0x145   :  { %v571_v17 = vpop.f32.mrb[52].mxu0  ;;  %v924_v18 = vpop.f32.mrb[52].mxu1 }
 0x146   :  { %v572_v19 = vadd.f32 %v571_v17, %v1801_v43  ;;  %v925_v20 = vadd.f32 %v924_v18, %v1803_v44  ;;  %v573_v21 = vpop.f32.mrb[53].mxu0  ;;  %v926_v22 = vpop.f32.mrb[53].mxu1 }
 0x147   :  { %v574_v23 = vadd.f32 %v573_v21, %v1805_v45  ;;  %v927_v24 = vadd.f32 %v926_v22, %v1807_v46  ;;  %v575_v25 = vpop.f32.mrb[54].mxu0  ;;  %v928_v26 = vpop.f32.mrb[54].mxu1 }
 0x148   :  { %1217 = vst [vmem:[#allocation2 + $0x340] sm:$0xff] %v572_v19  ;;  %1219 = vst [vmem:[#allocation2 + $0x350] sm:$0xff] %v925_v20  ;;  %v576_v27 = vadd.f32 %v575_v25, %v1801_v43  ;;  %v929_v28 = vadd.f32 %v928_v26, %v1803_v44  ;;  %v577_v29 = vpop.f32.mrb[55].mxu0  ;;  %v930_v30 = vpop.f32.mrb[55].mxu1 }
 0x149   :  { %1218 = vst [vmem:[#allocation2 + $0x348] sm:$0xff] %v574_v23  ;;  %1220 = vst [vmem:[#allocation2 + $0x358] sm:$0xff] %v927_v24  ;;  %v578_v31 = vadd.f32 %v577_v29, %v1805_v45  ;;  %v931_v32 = vadd.f32 %v930_v30, %v1807_v46 }
 0x14a   :  { %1221 = vst [vmem:[#allocation2 + $0x360] sm:$0xff] %v576_v27  ;;  %1223 = vst [vmem:[#allocation2 + $0x370] sm:$0xff] %v929_v28 }
 0x14b   :  { %1222 = vst [vmem:[#allocation2 + $0x368] sm:$0xff] %v578_v31  ;;  %1224 = vst [vmem:[#allocation2 + $0x378] sm:$0xff] %v931_v32 }
 0x14d   :  { %v581_v33 = vpop.f32.mrb[56].mxu0  ;;  %v934_v34 = vpop.f32.mrb[56].mxu1 }
 0x14e   :  { %v582_v35 = vadd.f32 %v581_v33, %v1801_v43  ;;  %v935_v36 = vadd.f32 %v934_v34, %v1803_v44  ;;  %v583_v37 = vpop.f32.mrb[57].mxu0  ;;  %v936_v38 = vpop.f32.mrb[57].mxu1 }
 0x14f   :  { %v584_v39 = vadd.f32 %v583_v37, %v1805_v45  ;;  %v937_v40 = vadd.f32 %v936_v38, %v1807_v46  ;;  %v585_v41 = vpop.f32.mrb[58].mxu0  ;;  %v938_v42 = vpop.f32.mrb[58].mxu1 }
 0x150   :  { %1225 = vst [vmem:[#allocation2 + $0x380] sm:$0xff] %v582_v35  ;;  %1227 = vst [vmem:[#allocation2 + $0x390] sm:$0xff] %v935_v36  ;;  %v586_v47 = vadd.f32 %v585_v41, %v1801_v43  ;;  %v939_v48 = vadd.f32 %v938_v42, %v1803_v44  ;;  %v587_v49 = vpop.f32.mrb[59].mxu0  ;;  %v940_v50 = vpop.f32.mrb[59].mxu1 }
 0x151   :  { %1226 = vst [vmem:[#allocation2 + $0x388] sm:$0xff] %v584_v39  ;;  %1228 = vst [vmem:[#allocation2 + $0x398] sm:$0xff] %v937_v40  ;;  %v588_v51 = vadd.f32 %v587_v49, %v1805_v45  ;;  %v941_v52 = vadd.f32 %v940_v50, %v1807_v46 }
 0x152   :  { %1229 = vst [vmem:[#allocation2 + $0x3a0] sm:$0xff] %v586_v47  ;;  %1231 = vst [vmem:[#allocation2 + $0x3b0] sm:$0xff] %v939_v48 }
 0x153   :  { %1230 = vst [vmem:[#allocation2 + $0x3a8] sm:$0xff] %v588_v51  ;;  %1232 = vst [vmem:[#allocation2 + $0x3b8] sm:$0xff] %v941_v52 }
 0x155   :  { %v591_v53 = vpop.f32.mrb[60].mxu0  ;;  %v944_v54 = vpop.f32.mrb[60].mxu1 }
 0x156   :  { %v592_v55 = vadd.f32 %v591_v53, %v1801_v43  ;;  %v945_v56 = vadd.f32 %v944_v54, %v1803_v44  ;;  %v593_v57 = vpop.f32.mrb[61].mxu0  ;;  %v946_v58 = vpop.f32.mrb[61].mxu1 }
 0x157   :  { %v594_v59 = vadd.f32 %v593_v57, %v1805_v45  ;;  %v947_v60 = vadd.f32 %v946_v58, %v1807_v46  ;;  %v595_v61 = vpop.f32.mrb[62].mxu0  ;;  %v948_v62 = vpop.f32.mrb[62].mxu1 }
 0x158   :  { %1233 = vst [vmem:[#allocation2 + $0x3c0] sm:$0xff] %v592_v55  ;;  %1235 = vst [vmem:[#allocation2 + $0x3d0] sm:$0xff] %v945_v56  ;;  %v596_v63 = vadd.f32 %v595_v61, %v1801_v43  ;;  %v949_v0 = vadd.f32 %v948_v62, %v1803_v44  ;;  %v597_v1 = vpop.f32.mrb[63].mxu0  ;;  %v950_v3 = vpop.f32.mrb[63].mxu1 }
 0x159   :  { %1234 = vst [vmem:[#allocation2 + $0x3c8] sm:$0xff] %v594_v59  ;;  %1236 = vst [vmem:[#allocation2 + $0x3d8] sm:$0xff] %v947_v60  ;;  %v598_v2 = vadd.f32 %v597_v1, %v1805_v45  ;;  %v951_v4 = vadd.f32 %v950_v3, %v1807_v46 }
 0x15a   :  { %1237 = vst [vmem:[#allocation2 + $0x3e0] sm:$0xff] %v596_v63  ;;  %1239 = vst [vmem:[#allocation2 + $0x3f0] sm:$0xff] %v949_v0 }
 0x15b   :  { %1238 = vst [vmem:[#allocation2 + $0x3e8] sm:$0xff] %v598_v2  ;;  %1240 = vst [vmem:[#allocation2 + $0x3f8] sm:$0xff] %v951_v4 }
 0x15d   :  { %v601_v5 = vpop.f32.mrb[64].mxu0  ;;  %v954_v6 = vpop.f32.mrb[64].mxu1 }
 0x15e   :  { %v602_v7 = vadd.f32 %v601_v5, %v1801_v43  ;;  %v955_v8 = vadd.f32 %v954_v6, %v1803_v44  ;;  %v603_v9 = vpop.f32.mrb[65].mxu0  ;;  %v956_v10 = vpop.f32.mrb[65].mxu1 }
 0x15f   :  { %v604_v11 = vadd.f32 %v603_v9, %v1805_v45  ;;  %v957_v12 = vadd.f32 %v956_v10, %v1807_v46  ;;  %v605_v13 = vpop.f32.mrb[66].mxu0  ;;  %v958_v14 = vpop.f32.mrb[66].mxu1 }
 0x160   :  { %1241 = vst [vmem:[#allocation2 + $0x400] sm:$0xff] %v602_v7  ;;  %1243 = vst [vmem:[#allocation2 + $0x410] sm:$0xff] %v955_v8  ;;  %v606_v15 = vadd.f32 %v605_v13, %v1801_v43  ;;  %v959_v16 = vadd.f32 %v958_v14, %v1803_v44  ;;  %v607_v17 = vpop.f32.mrb[67].mxu0  ;;  %v960_v18 = vpop.f32.mrb[67].mxu1 }
 0x161   :  { %1242 = vst [vmem:[#allocation2 + $0x408] sm:$0xff] %v604_v11  ;;  %1244 = vst [vmem:[#allocation2 + $0x418] sm:$0xff] %v957_v12  ;;  %v608_v19 = vadd.f32 %v607_v17, %v1805_v45  ;;  %v961_v20 = vadd.f32 %v960_v18, %v1807_v46 }
 0x162   :  { %1245 = vst [vmem:[#allocation2 + $0x420] sm:$0xff] %v606_v15  ;;  %1247 = vst [vmem:[#allocation2 + $0x430] sm:$0xff] %v959_v16 }
 0x163   :  { %1246 = vst [vmem:[#allocation2 + $0x428] sm:$0xff] %v608_v19  ;;  %1248 = vst [vmem:[#allocation2 + $0x438] sm:$0xff] %v961_v20 }
 0x165   :  { %v611_v21 = vpop.f32.mrb[68].mxu0  ;;  %v964_v22 = vpop.f32.mrb[68].mxu1 }
 0x166   :  { %v612_v23 = vadd.f32 %v611_v21, %v1801_v43  ;;  %v965_v24 = vadd.f32 %v964_v22, %v1803_v44  ;;  %v613_v25 = vpop.f32.mrb[69].mxu0  ;;  %v966_v26 = vpop.f32.mrb[69].mxu1 }
 0x167   :  { %v614_v27 = vadd.f32 %v613_v25, %v1805_v45  ;;  %v967_v28 = vadd.f32 %v966_v26, %v1807_v46  ;;  %v615_v29 = vpop.f32.mrb[70].mxu0  ;;  %v968_v30 = vpop.f32.mrb[70].mxu1 }
 0x168   :  { %1249 = vst [vmem:[#allocation2 + $0x440] sm:$0xff] %v612_v23  ;;  %1251 = vst [vmem:[#allocation2 + $0x450] sm:$0xff] %v965_v24  ;;  %v616_v31 = vadd.f32 %v615_v29, %v1801_v43  ;;  %v969_v32 = vadd.f32 %v968_v30, %v1803_v44  ;;  %v617_v33 = vpop.f32.mrb[71].mxu0  ;;  %v970_v34 = vpop.f32.mrb[71].mxu1 }
 0x169   :  { %1250 = vst [vmem:[#allocation2 + $0x448] sm:$0xff] %v614_v27  ;;  %1252 = vst [vmem:[#allocation2 + $0x458] sm:$0xff] %v967_v28  ;;  %v618_v35 = vadd.f32 %v617_v33, %v1805_v45  ;;  %v971_v36 = vadd.f32 %v970_v34, %v1807_v46 }
 0x16a   :  { %1253 = vst [vmem:[#allocation2 + $0x460] sm:$0xff] %v616_v31  ;;  %1255 = vst [vmem:[#allocation2 + $0x470] sm:$0xff] %v969_v32 }
 0x16b   :  { %1254 = vst [vmem:[#allocation2 + $0x468] sm:$0xff] %v618_v35  ;;  %1256 = vst [vmem:[#allocation2 + $0x478] sm:$0xff] %v971_v36 }
 0x16d   :  { %v621_v37 = vpop.f32.mrb[72].mxu0  ;;  %v974_v38 = vpop.f32.mrb[72].mxu1 }
 0x16e   :  { %v622_v39 = vadd.f32 %v621_v37, %v1801_v43  ;;  %v975_v40 = vadd.f32 %v974_v38, %v1803_v44  ;;  %v623_v41 = vpop.f32.mrb[73].mxu0  ;;  %v976_v42 = vpop.f32.mrb[73].mxu1 }
 0x16f   :  { %v624_v47 = vadd.f32 %v623_v41, %v1805_v45  ;;  %v977_v48 = vadd.f32 %v976_v42, %v1807_v46  ;;  %v625_v49 = vpop.f32.mrb[74].mxu0  ;;  %v978_v50 = vpop.f32.mrb[74].mxu1 }
 0x170   :  { %1257 = vst [vmem:[#allocation2 + $0x480] sm:$0xff] %v622_v39  ;;  %1259 = vst [vmem:[#allocation2 + $0x490] sm:$0xff] %v975_v40  ;;  %v626_v51 = vadd.f32 %v625_v49, %v1801_v43  ;;  %v979_v52 = vadd.f32 %v978_v50, %v1803_v44  ;;  %v627_v53 = vpop.f32.mrb[75].mxu0  ;;  %v980_v54 = vpop.f32.mrb[75].mxu1 }
 0x171   :  { %1258 = vst [vmem:[#allocation2 + $0x488] sm:$0xff] %v624_v47  ;;  %1260 = vst [vmem:[#allocation2 + $0x498] sm:$0xff] %v977_v48  ;;  %v628_v55 = vadd.f32 %v627_v53, %v1805_v45  ;;  %v981_v56 = vadd.f32 %v980_v54, %v1807_v46 }
 0x172   :  { %1261 = vst [vmem:[#allocation2 + $0x4a0] sm:$0xff] %v626_v51  ;;  %1263 = vst [vmem:[#allocation2 + $0x4b0] sm:$0xff] %v979_v52 }
 0x173   :  { %1262 = vst [vmem:[#allocation2 + $0x4a8] sm:$0xff] %v628_v55  ;;  %1264 = vst [vmem:[#allocation2 + $0x4b8] sm:$0xff] %v981_v56 }
 0x175   :  { %v631_v57 = vpop.f32.mrb[76].mxu0  ;;  %v984_v58 = vpop.f32.mrb[76].mxu1 }
 0x176   :  { %v632_v59 = vadd.f32 %v631_v57, %v1801_v43  ;;  %v985_v60 = vadd.f32 %v984_v58, %v1803_v44  ;;  %v633_v61 = vpop.f32.mrb[77].mxu0  ;;  %v986_v62 = vpop.f32.mrb[77].mxu1 }
 0x177   :  { %v634_v63 = vadd.f32 %v633_v61, %v1805_v45  ;;  %v987_v0 = vadd.f32 %v986_v62, %v1807_v46  ;;  %v635_v1 = vpop.f32.mrb[78].mxu0  ;;  %v988_v3 = vpop.f32.mrb[78].mxu1 }
 0x178   :  { %1265 = vst [vmem:[#allocation2 + $0x4c0] sm:$0xff] %v632_v59  ;;  %1267 = vst [vmem:[#allocation2 + $0x4d0] sm:$0xff] %v985_v60  ;;  %v636_v2 = vadd.f32 %v635_v1, %v1801_v43  ;;  %v989_v4 = vadd.f32 %v988_v3, %v1803_v44  ;;  %v637_v5 = vpop.f32.mrb[79].mxu0  ;;  %v990_v6 = vpop.f32.mrb[79].mxu1 }
 0x179   :  { %1266 = vst [vmem:[#allocation2 + $0x4c8] sm:$0xff] %v634_v63  ;;  %1268 = vst [vmem:[#allocation2 + $0x4d8] sm:$0xff] %v987_v0  ;;  %v638_v7 = vadd.f32 %v637_v5, %v1805_v45  ;;  %v991_v8 = vadd.f32 %v990_v6, %v1807_v46 }
 0x17a   :  { %1269 = vst [vmem:[#allocation2 + $0x4e0] sm:$0xff] %v636_v2  ;;  %1271 = vst [vmem:[#allocation2 + $0x4f0] sm:$0xff] %v989_v4 }
 0x17b   :  { %1270 = vst [vmem:[#allocation2 + $0x4e8] sm:$0xff] %v638_v7  ;;  %1272 = vst [vmem:[#allocation2 + $0x4f8] sm:$0xff] %v991_v8 }
 0x17d   :  { %v641_v9 = vpop.f32.mrb[80].mxu0  ;;  %v994_v10 = vpop.f32.mrb[80].mxu1 }
 0x17e   :  { %v642_v11 = vadd.f32 %v641_v9, %v1801_v43  ;;  %v995_v12 = vadd.f32 %v994_v10, %v1803_v44  ;;  %v643_v13 = vpop.f32.mrb[81].mxu0  ;;  %v996_v14 = vpop.f32.mrb[81].mxu1 }
 0x17f   :  { %v644_v15 = vadd.f32 %v643_v13, %v1805_v45  ;;  %v997_v16 = vadd.f32 %v996_v14, %v1807_v46  ;;  %v645_v17 = vpop.f32.mrb[82].mxu0  ;;  %v998_v18 = vpop.f32.mrb[82].mxu1 }
 0x180   :  { %1273 = vst [vmem:[#allocation2 + $0x500] sm:$0xff] %v642_v11  ;;  %1275 = vst [vmem:[#allocation2 + $0x510] sm:$0xff] %v995_v12  ;;  %v646_v19 = vadd.f32 %v645_v17, %v1801_v43  ;;  %v999_v20 = vadd.f32 %v998_v18, %v1803_v44  ;;  %v647_v21 = vpop.f32.mrb[83].mxu0  ;;  %v1000_v22 = vpop.f32.mrb[83].mxu1 }
 0x181   :  { %1274 = vst [vmem:[#allocation2 + $0x508] sm:$0xff] %v644_v15  ;;  %1276 = vst [vmem:[#allocation2 + $0x518] sm:$0xff] %v997_v16  ;;  %v648_v23 = vadd.f32 %v647_v21, %v1805_v45  ;;  %v1001_v24 = vadd.f32 %v1000_v22, %v1807_v46 }
 0x182   :  { %1277 = vst [vmem:[#allocation2 + $0x520] sm:$0xff] %v646_v19  ;;  %1279 = vst [vmem:[#allocation2 + $0x530] sm:$0xff] %v999_v20 }
 0x183   :  { %1278 = vst [vmem:[#allocation2 + $0x528] sm:$0xff] %v648_v23  ;;  %1280 = vst [vmem:[#allocation2 + $0x538] sm:$0xff] %v1001_v24 }
 0x185   :  { %v651_v25 = vpop.f32.mrb[84].mxu0  ;;  %v1004_v26 = vpop.f32.mrb[84].mxu1 }
 0x186   :  { %v652_v27 = vadd.f32 %v651_v25, %v1801_v43  ;;  %v1005_v28 = vadd.f32 %v1004_v26, %v1803_v44  ;;  %v653_v29 = vpop.f32.mrb[85].mxu0  ;;  %v1006_v30 = vpop.f32.mrb[85].mxu1 }
 0x187   :  { %v654_v31 = vadd.f32 %v653_v29, %v1805_v45  ;;  %v1007_v32 = vadd.f32 %v1006_v30, %v1807_v46  ;;  %v655_v33 = vpop.f32.mrb[86].mxu0  ;;  %v1008_v34 = vpop.f32.mrb[86].mxu1 }
 0x188   :  { %1281 = vst [vmem:[#allocation2 + $0x540] sm:$0xff] %v652_v27  ;;  %1283 = vst [vmem:[#allocation2 + $0x550] sm:$0xff] %v1005_v28  ;;  %v656_v35 = vadd.f32 %v655_v33, %v1801_v43  ;;  %v1009_v36 = vadd.f32 %v1008_v34, %v1803_v44  ;;  %v657_v37 = vpop.f32.mrb[87].mxu0  ;;  %v1010_v38 = vpop.f32.mrb[87].mxu1 }
 0x189   :  { %1282 = vst [vmem:[#allocation2 + $0x548] sm:$0xff] %v654_v31  ;;  %1284 = vst [vmem:[#allocation2 + $0x558] sm:$0xff] %v1007_v32  ;;  %v658_v39 = vadd.f32 %v657_v37, %v1805_v45  ;;  %v1011_v40 = vadd.f32 %v1010_v38, %v1807_v46 }
 0x18a   :  { %1285 = vst [vmem:[#allocation2 + $0x560] sm:$0xff] %v656_v35  ;;  %1287 = vst [vmem:[#allocation2 + $0x570] sm:$0xff] %v1009_v36 }
 0x18b   :  { %1286 = vst [vmem:[#allocation2 + $0x568] sm:$0xff] %v658_v39  ;;  %1288 = vst [vmem:[#allocation2 + $0x578] sm:$0xff] %v1011_v40 }
 0x18d   :  { %v661_v41 = vpop.f32.mrb[88].mxu0  ;;  %v1014_v42 = vpop.f32.mrb[88].mxu1 }
 0x18e   :  { %v662_v47 = vadd.f32 %v661_v41, %v1801_v43  ;;  %v1015_v48 = vadd.f32 %v1014_v42, %v1803_v44  ;;  %v663_v49 = vpop.f32.mrb[89].mxu0  ;;  %v1016_v50 = vpop.f32.mrb[89].mxu1 }
 0x18f   :  { %v664_v51 = vadd.f32 %v663_v49, %v1805_v45  ;;  %v1017_v52 = vadd.f32 %v1016_v50, %v1807_v46  ;;  %v665_v53 = vpop.f32.mrb[90].mxu0  ;;  %v1018_v54 = vpop.f32.mrb[90].mxu1 }
 0x190   :  { %1289 = vst [vmem:[#allocation2 + $0x580] sm:$0xff] %v662_v47  ;;  %1291 = vst [vmem:[#allocation2 + $0x590] sm:$0xff] %v1015_v48  ;;  %v666_v55 = vadd.f32 %v665_v53, %v1801_v43  ;;  %v1019_v56 = vadd.f32 %v1018_v54, %v1803_v44  ;;  %v667_v57 = vpop.f32.mrb[91].mxu0  ;;  %v1020_v58 = vpop.f32.mrb[91].mxu1 }
 0x191   :  { %1290 = vst [vmem:[#allocation2 + $0x588] sm:$0xff] %v664_v51  ;;  %1292 = vst [vmem:[#allocation2 + $0x598] sm:$0xff] %v1017_v52  ;;  %v668_v59 = vadd.f32 %v667_v57, %v1805_v45  ;;  %v1021_v60 = vadd.f32 %v1020_v58, %v1807_v46 }
 0x192   :  { %1293 = vst [vmem:[#allocation2 + $0x5a0] sm:$0xff] %v666_v55  ;;  %1295 = vst [vmem:[#allocation2 + $0x5b0] sm:$0xff] %v1019_v56 }
 0x193   :  { %1294 = vst [vmem:[#allocation2 + $0x5a8] sm:$0xff] %v668_v59  ;;  %1296 = vst [vmem:[#allocation2 + $0x5b8] sm:$0xff] %v1021_v60 }
 0x195   :  { %v671_v61 = vpop.f32.mrb[92].mxu0  ;;  %v1024_v62 = vpop.f32.mrb[92].mxu1 }
 0x196   :  { %v672_v63 = vadd.f32 %v671_v61, %v1801_v43  ;;  %v1025_v0 = vadd.f32 %v1024_v62, %v1803_v44  ;;  %v673_v1 = vpop.f32.mrb[93].mxu0  ;;  %v1026_v3 = vpop.f32.mrb[93].mxu1 }
 0x197   :  { %v674_v2 = vadd.f32 %v673_v1, %v1805_v45  ;;  %v1027_v4 = vadd.f32 %v1026_v3, %v1807_v46  ;;  %v675_v5 = vpop.f32.mrb[94].mxu0  ;;  %v1028_v6 = vpop.f32.mrb[94].mxu1 }
 0x198   :  { %1297 = vst [vmem:[#allocation2 + $0x5c0] sm:$0xff] %v672_v63  ;;  %1299 = vst [vmem:[#allocation2 + $0x5d0] sm:$0xff] %v1025_v0  ;;  %v676_v7 = vadd.f32 %v675_v5, %v1801_v43  ;;  %v1029_v8 = vadd.f32 %v1028_v6, %v1803_v44  ;;  %v677_v9 = vpop.f32.mrb[95].mxu0  ;;  %v1030_v10 = vpop.f32.mrb[95].mxu1 }
 0x199   :  { %1298 = vst [vmem:[#allocation2 + $0x5c8] sm:$0xff] %v674_v2  ;;  %1300 = vst [vmem:[#allocation2 + $0x5d8] sm:$0xff] %v1027_v4  ;;  %v678_v11 = vadd.f32 %v677_v9, %v1805_v45  ;;  %v1031_v12 = vadd.f32 %v1030_v10, %v1807_v46 }
 0x19a   :  { %1301 = vst [vmem:[#allocation2 + $0x5e0] sm:$0xff] %v676_v7  ;;  %1303 = vst [vmem:[#allocation2 + $0x5f0] sm:$0xff] %v1029_v8 }
 0x19b   :  { %1302 = vst [vmem:[#allocation2 + $0x5e8] sm:$0xff] %v678_v11  ;;  %1304 = vst [vmem:[#allocation2 + $0x5f8] sm:$0xff] %v1031_v12 }
 0x19d   :  { %v681_v13 = vpop.f32.mrb[96].mxu0  ;;  %v1034_v14 = vpop.f32.mrb[96].mxu1 }
 0x19e   :  { %v682_v15 = vadd.f32 %v681_v13, %v1801_v43  ;;  %v1035_v16 = vadd.f32 %v1034_v14, %v1803_v44  ;;  %v683_v17 = vpop.f32.mrb[97].mxu0  ;;  %v1036_v18 = vpop.f32.mrb[97].mxu1 }
 0x19f   :  { %v684_v19 = vadd.f32 %v683_v17, %v1805_v45  ;;  %v1037_v20 = vadd.f32 %v1036_v18, %v1807_v46  ;;  %v685_v21 = vpop.f32.mrb[98].mxu0  ;;  %v1038_v22 = vpop.f32.mrb[98].mxu1 }
 0x1a0   :  { %1305 = vst [vmem:[#allocation2 + $0x600] sm:$0xff] %v682_v15  ;;  %1307 = vst [vmem:[#allocation2 + $0x610] sm:$0xff] %v1035_v16  ;;  %v686_v23 = vadd.f32 %v685_v21, %v1801_v43  ;;  %v1039_v24 = vadd.f32 %v1038_v22, %v1803_v44  ;;  %v687_v25 = vpop.f32.mrb[99].mxu0  ;;  %v1040_v26 = vpop.f32.mrb[99].mxu1 }
 0x1a1   :  { %1306 = vst [vmem:[#allocation2 + $0x608] sm:$0xff] %v684_v19  ;;  %1308 = vst [vmem:[#allocation2 + $0x618] sm:$0xff] %v1037_v20  ;;  %v688_v27 = vadd.f32 %v687_v25, %v1805_v45  ;;  %v1041_v28 = vadd.f32 %v1040_v26, %v1807_v46 }
 0x1a2   :  { %1309 = vst [vmem:[#allocation2 + $0x620] sm:$0xff] %v686_v23  ;;  %1311 = vst [vmem:[#allocation2 + $0x630] sm:$0xff] %v1039_v24 }
 0x1a3   :  { %1310 = vst [vmem:[#allocation2 + $0x628] sm:$0xff] %v688_v27  ;;  %1312 = vst [vmem:[#allocation2 + $0x638] sm:$0xff] %v1041_v28 }
 0x1a5   :  { %v691_v29 = vpop.f32.mrb[100].mxu0  ;;  %v1044_v30 = vpop.f32.mrb[100].mxu1 }
 0x1a6   :  { %v692_v31 = vadd.f32 %v691_v29, %v1801_v43  ;;  %v1045_v32 = vadd.f32 %v1044_v30, %v1803_v44  ;;  %v693_v33 = vpop.f32.mrb[101].mxu0  ;;  %v1046_v34 = vpop.f32.mrb[101].mxu1 }
 0x1a7   :  { %v694_v35 = vadd.f32 %v693_v33, %v1805_v45  ;;  %v1047_v36 = vadd.f32 %v1046_v34, %v1807_v46  ;;  %v695_v37 = vpop.f32.mrb[102].mxu0  ;;  %v1048_v38 = vpop.f32.mrb[102].mxu1 }
 0x1a8   :  { %1313 = vst [vmem:[#allocation2 + $0x640] sm:$0xff] %v692_v31  ;;  %1315 = vst [vmem:[#allocation2 + $0x650] sm:$0xff] %v1045_v32  ;;  %v696_v39 = vadd.f32 %v695_v37, %v1801_v43  ;;  %v1049_v40 = vadd.f32 %v1048_v38, %v1803_v44  ;;  %v697_v41 = vpop.f32.mrb[103].mxu0  ;;  %v1050_v42 = vpop.f32.mrb[103].mxu1 }
 0x1a9   :  { %1314 = vst [vmem:[#allocation2 + $0x648] sm:$0xff] %v694_v35  ;;  %1316 = vst [vmem:[#allocation2 + $0x658] sm:$0xff] %v1047_v36  ;;  %v698_v47 = vadd.f32 %v697_v41, %v1805_v45  ;;  %v1051_v48 = vadd.f32 %v1050_v42, %v1807_v46 }
 0x1aa   :  { %1317 = vst [vmem:[#allocation2 + $0x660] sm:$0xff] %v696_v39  ;;  %1319 = vst [vmem:[#allocation2 + $0x670] sm:$0xff] %v1049_v40 }
 0x1ab   :  { %1318 = vst [vmem:[#allocation2 + $0x668] sm:$0xff] %v698_v47  ;;  %1320 = vst [vmem:[#allocation2 + $0x678] sm:$0xff] %v1051_v48 }
 0x1ad   :  { %v701_v49 = vpop.f32.mrb[104].mxu0  ;;  %v1054_v50 = vpop.f32.mrb[104].mxu1 }
 0x1ae   :  { %v702_v51 = vadd.f32 %v701_v49, %v1801_v43  ;;  %v1055_v52 = vadd.f32 %v1054_v50, %v1803_v44  ;;  %v703_v53 = vpop.f32.mrb[105].mxu0  ;;  %v1056_v54 = vpop.f32.mrb[105].mxu1 }
 0x1af   :  { %v704_v55 = vadd.f32 %v703_v53, %v1805_v45  ;;  %v1057_v56 = vadd.f32 %v1056_v54, %v1807_v46  ;;  %v705_v57 = vpop.f32.mrb[106].mxu0  ;;  %v1058_v58 = vpop.f32.mrb[106].mxu1 }
 0x1b0   :  { %1321 = vst [vmem:[#allocation2 + $0x680] sm:$0xff] %v702_v51  ;;  %1323 = vst [vmem:[#allocation2 + $0x690] sm:$0xff] %v1055_v52  ;;  %v706_v59 = vadd.f32 %v705_v57, %v1801_v43  ;;  %v1059_v60 = vadd.f32 %v1058_v58, %v1803_v44  ;;  %v707_v61 = vpop.f32.mrb[107].mxu0  ;;  %v1060_v62 = vpop.f32.mrb[107].mxu1 }
 0x1b1   :  { %1322 = vst [vmem:[#allocation2 + $0x688] sm:$0xff] %v704_v55  ;;  %1324 = vst [vmem:[#allocation2 + $0x698] sm:$0xff] %v1057_v56  ;;  %v708_v63 = vadd.f32 %v707_v61, %v1805_v45  ;;  %v1061_v0 = vadd.f32 %v1060_v62, %v1807_v46 }
 0x1b2   :  { %1325 = vst [vmem:[#allocation2 + $0x6a0] sm:$0xff] %v706_v59  ;;  %1327 = vst [vmem:[#allocation2 + $0x6b0] sm:$0xff] %v1059_v60 }
 0x1b3   :  { %1326 = vst [vmem:[#allocation2 + $0x6a8] sm:$0xff] %v708_v63  ;;  %1328 = vst [vmem:[#allocation2 + $0x6b8] sm:$0xff] %v1061_v0 }
 0x1b5   :  { %v711_v1 = vpop.f32.mrb[108].mxu0  ;;  %v1064_v3 = vpop.f32.mrb[108].mxu1 }
 0x1b6   :  { %v712_v2 = vadd.f32 %v711_v1, %v1801_v43  ;;  %v1065_v4 = vadd.f32 %v1064_v3, %v1803_v44  ;;  %v713_v5 = vpop.f32.mrb[109].mxu0  ;;  %v1066_v6 = vpop.f32.mrb[109].mxu1 }
 0x1b7   :  { %v714_v7 = vadd.f32 %v713_v5, %v1805_v45  ;;  %v1067_v8 = vadd.f32 %v1066_v6, %v1807_v46  ;;  %v715_v9 = vpop.f32.mrb[110].mxu0  ;;  %v1068_v10 = vpop.f32.mrb[110].mxu1 }
 0x1b8   :  { %1329 = vst [vmem:[#allocation2 + $0x6c0] sm:$0xff] %v712_v2  ;;  %1331 = vst [vmem:[#allocation2 + $0x6d0] sm:$0xff] %v1065_v4  ;;  %v716_v11 = vadd.f32 %v715_v9, %v1801_v43  ;;  %v1069_v12 = vadd.f32 %v1068_v10, %v1803_v44  ;;  %v717_v13 = vpop.f32.mrb[111].mxu0  ;;  %v1070_v14 = vpop.f32.mrb[111].mxu1 }
 0x1b9   :  { %1330 = vst [vmem:[#allocation2 + $0x6c8] sm:$0xff] %v714_v7  ;;  %1332 = vst [vmem:[#allocation2 + $0x6d8] sm:$0xff] %v1067_v8  ;;  %v718_v15 = vadd.f32 %v717_v13, %v1805_v45  ;;  %v1071_v16 = vadd.f32 %v1070_v14, %v1807_v46 }
 0x1ba   :  { %1333 = vst [vmem:[#allocation2 + $0x6e0] sm:$0xff] %v716_v11  ;;  %1335 = vst [vmem:[#allocation2 + $0x6f0] sm:$0xff] %v1069_v12 }
 0x1bb   :  { %1334 = vst [vmem:[#allocation2 + $0x6e8] sm:$0xff] %v718_v15  ;;  %1336 = vst [vmem:[#allocation2 + $0x6f8] sm:$0xff] %v1071_v16 }
 0x1bd   :  { %v721_v17 = vpop.f32.mrb[112].mxu0  ;;  %v1074_v18 = vpop.f32.mrb[112].mxu1 }
 0x1be   :  { %v722_v19 = vadd.f32 %v721_v17, %v1801_v43  ;;  %v1075_v20 = vadd.f32 %v1074_v18, %v1803_v44  ;;  %v723_v21 = vpop.f32.mrb[113].mxu0  ;;  %v1076_v22 = vpop.f32.mrb[113].mxu1 }
 0x1bf   :  { %v724_v23 = vadd.f32 %v723_v21, %v1805_v45  ;;  %v1077_v24 = vadd.f32 %v1076_v22, %v1807_v46  ;;  %v725_v25 = vpop.f32.mrb[114].mxu0  ;;  %v1078_v26 = vpop.f32.mrb[114].mxu1 }
 0x1c0   :  { %1337 = vst [vmem:[#allocation2 + $0x700] sm:$0xff] %v722_v19  ;;  %1339 = vst [vmem:[#allocation2 + $0x710] sm:$0xff] %v1075_v20  ;;  %v726_v27 = vadd.f32 %v725_v25, %v1801_v43  ;;  %v1079_v28 = vadd.f32 %v1078_v26, %v1803_v44  ;;  %v727_v29 = vpop.f32.mrb[115].mxu0  ;;  %v1080_v30 = vpop.f32.mrb[115].mxu1 }
 0x1c1   :  { %1338 = vst [vmem:[#allocation2 + $0x708] sm:$0xff] %v724_v23  ;;  %1340 = vst [vmem:[#allocation2 + $0x718] sm:$0xff] %v1077_v24  ;;  %v728_v31 = vadd.f32 %v727_v29, %v1805_v45  ;;  %v1081_v32 = vadd.f32 %v1080_v30, %v1807_v46 }
 0x1c2   :  { %1341 = vst [vmem:[#allocation2 + $0x720] sm:$0xff] %v726_v27  ;;  %1343 = vst [vmem:[#allocation2 + $0x730] sm:$0xff] %v1079_v28 }
 0x1c3   :  { %1342 = vst [vmem:[#allocation2 + $0x728] sm:$0xff] %v728_v31  ;;  %1344 = vst [vmem:[#allocation2 + $0x738] sm:$0xff] %v1081_v32 }
 0x1c5   :  { %v731_v33 = vpop.f32.mrb[116].mxu0  ;;  %v1084_v34 = vpop.f32.mrb[116].mxu1 }
 0x1c6   :  { %v732_v35 = vadd.f32 %v731_v33, %v1801_v43  ;;  %v1085_v36 = vadd.f32 %v1084_v34, %v1803_v44  ;;  %v733_v37 = vpop.f32.mrb[117].mxu0  ;;  %v1086_v38 = vpop.f32.mrb[117].mxu1 }
 0x1c7   :  { %v734_v39 = vadd.f32 %v733_v37, %v1805_v45  ;;  %v1087_v40 = vadd.f32 %v1086_v38, %v1807_v46  ;;  %v735_v41 = vpop.f32.mrb[118].mxu0  ;;  %v1088_v42 = vpop.f32.mrb[118].mxu1 }
 0x1c8   :  { %1345 = vst [vmem:[#allocation2 + $0x740] sm:$0xff] %v732_v35  ;;  %1347 = vst [vmem:[#allocation2 + $0x750] sm:$0xff] %v1085_v36  ;;  %v736_v47 = vadd.f32 %v735_v41, %v1801_v43  ;;  %v1089_v48 = vadd.f32 %v1088_v42, %v1803_v44  ;;  %v737_v49 = vpop.f32.mrb[119].mxu0  ;;  %v1090_v50 = vpop.f32.mrb[119].mxu1 }
 0x1c9   :  { %1346 = vst [vmem:[#allocation2 + $0x748] sm:$0xff] %v734_v39  ;;  %1348 = vst [vmem:[#allocation2 + $0x758] sm:$0xff] %v1087_v40  ;;  %v738_v51 = vadd.f32 %v737_v49, %v1805_v45  ;;  %v1091_v52 = vadd.f32 %v1090_v50, %v1807_v46 }
 0x1ca   :  { %1349 = vst [vmem:[#allocation2 + $0x760] sm:$0xff] %v736_v47  ;;  %1351 = vst [vmem:[#allocation2 + $0x770] sm:$0xff] %v1089_v48 }
 0x1cb   :  { %1350 = vst [vmem:[#allocation2 + $0x768] sm:$0xff] %v738_v51  ;;  %1352 = vst [vmem:[#allocation2 + $0x778] sm:$0xff] %v1091_v52 }
 0x1cd   :  { %v741_v53 = vpop.f32.mrb[120].mxu0  ;;  %v1094_v54 = vpop.f32.mrb[120].mxu1 }
 0x1ce   :  { %v742_v55 = vadd.f32 %v741_v53, %v1801_v43  ;;  %v1095_v56 = vadd.f32 %v1094_v54, %v1803_v44  ;;  %v743_v57 = vpop.f32.mrb[121].mxu0  ;;  %v1096_v58 = vpop.f32.mrb[121].mxu1 }
 0x1cf   :  { %v744_v59 = vadd.f32 %v743_v57, %v1805_v45  ;;  %v1097_v60 = vadd.f32 %v1096_v58, %v1807_v46  ;;  %v745_v61 = vpop.f32.mrb[122].mxu0  ;;  %v1098_v62 = vpop.f32.mrb[122].mxu1 }
 0x1d0   :  { %1353 = vst [vmem:[#allocation2 + $0x780] sm:$0xff] %v742_v55  ;;  %1355 = vst [vmem:[#allocation2 + $0x790] sm:$0xff] %v1095_v56  ;;  %v746_v63 = vadd.f32 %v745_v61, %v1801_v43  ;;  %v1099_v0 = vadd.f32 %v1098_v62, %v1803_v44  ;;  %v747_v1 = vpop.f32.mrb[123].mxu0  ;;  %v1100_v3 = vpop.f32.mrb[123].mxu1 }
 0x1d1   :  { %1354 = vst [vmem:[#allocation2 + $0x788] sm:$0xff] %v744_v59  ;;  %1356 = vst [vmem:[#allocation2 + $0x798] sm:$0xff] %v1097_v60  ;;  %v748_v2 = vadd.f32 %v747_v1, %v1805_v45  ;;  %v1101_v4 = vadd.f32 %v1100_v3, %v1807_v46 }
 0x1d2   :  { %1357 = vst [vmem:[#allocation2 + $0x7a0] sm:$0xff] %v746_v63  ;;  %1359 = vst [vmem:[#allocation2 + $0x7b0] sm:$0xff] %v1099_v0 }
 0x1d3   :  { %1358 = vst [vmem:[#allocation2 + $0x7a8] sm:$0xff] %v748_v2  ;;  %1360 = vst [vmem:[#allocation2 + $0x7b8] sm:$0xff] %v1101_v4 }
 0x1d5   :  { %v751_v5 = vpop.f32.mrb[124].mxu0  ;;  %v1104_v6 = vpop.f32.mrb[124].mxu1 }
 0x1d6   :  { %v752_v7 = vadd.f32 %v751_v5, %v1801_v43  ;;  %v1105_v8 = vadd.f32 %v1104_v6, %v1803_v44  ;;  %v753_v9 = vpop.f32.mrb[125].mxu0  ;;  %v1106_v10 = vpop.f32.mrb[125].mxu1 }
 0x1d7   :  { %v754_v11 = vadd.f32 %v753_v9, %v1805_v45  ;;  %v1107_v12 = vadd.f32 %v1106_v10, %v1807_v46  ;;  %v755_v13 = vpop.f32.mrb[126].mxu0  ;;  %v1108_v14 = vpop.f32.mrb[126].mxu1 }
 0x1d8   :  { %1361 = vst [vmem:[#allocation2 + $0x7c0] sm:$0xff] %v752_v7  ;;  %1363 = vst [vmem:[#allocation2 + $0x7d0] sm:$0xff] %v1105_v8  ;;  %v756_v15 = vadd.f32 %v755_v13, %v1801_v43  ;;  %v1109_v16 = vadd.f32 %v1108_v14, %v1803_v44  ;;  %v757_v17 = vpop.f32.mrb[127].mxu0  ;;  %v1110_v18 = vpop.f32.mrb[127].mxu1 }
 0x1d9   :  { %1362 = vst [vmem:[#allocation2 + $0x7c8] sm:$0xff] %v754_v11  ;;  %1364 = vst [vmem:[#allocation2 + $0x7d8] sm:$0xff] %v1107_v12  ;;  %v758_v19 = vadd.f32 %v757_v17, %v1805_v45  ;;  %v1111_v20 = vadd.f32 %v1110_v18, %v1807_v46 }
 0x1da   :  { %1365 = vst [vmem:[#allocation2 + $0x7e0] sm:$0xff] %v756_v15  ;;  %1367 = vst [vmem:[#allocation2 + $0x7f0] sm:$0xff] %v1109_v16 }
 0x1db   :  { %1366 = vst [vmem:[#allocation2 + $0x7e8] sm:$0xff] %v758_v19  ;;  %1368 = vst [vmem:[#allocation2 + $0x7f8] sm:$0xff] %v1111_v20 }
 0x1dc   :  { %1548 = shalt.err (!%p1545_p4)
}
 0x1dd   :  { %s1549_s13 = scalar_lea.hbm %s2115_s3, 32768 }
 0x1de   :  { %p1550_p5 = scmp.ne.s32.totalorder %s2115_s3, %s1549_s13  ;;  %p1553_p6 = scmp.lt.u32.totalorder %s1549_s13, %s2115_s3 }
 0x1e0   :  { %p1555_p7 = pnand %p1553_p6, %p1550_p5 }
 0x1e2   :  { %1558 = shalt.err (!%p1555_p7)
}
 0x1e3   :  { %s1563_s18 = smov 512   ;;  %s1564_s19 = smov 32  }
 0x1e4   :  { %1380 = dma.vmem_to_hbm [thread:$0]  %s1375_s9, 32768, %s2115_s3, [#allocation3], %s1563_s18, %s1563_s18, %s1564_s19  }
 0x1e5   :  { %1559 = dma.done.wait [#allocation3], 32768  }
 0x1e6   :  { %1560 = vsyncadd [#allocation3], 4294934528 }
 0x1e7   :  { %1384 = vsyncpa [#allocation3], 1 }

</bundles_post_ra>
